<compile_context>
chip_gen: v6e
topology: v6e:2x2x1
jax: 0.10.0
libtpu: 0.0.40
codegen_flags: <defaults>
</compile_context>

<pallas_src>
import functools

import jax
import jax.numpy as jnp
from jax import lax
from jax.experimental import pallas as pl
from jax.experimental.pallas import tpu as pltpu


def _location_encoder_kernel(precision, x_ref, w_ref, sel_ref, b_ref, o_ref):
    # x_ref:   [T, 5*P]      P original rows packed per kernel row (row-major view)
    # w_ref:   [5*P, dim*P]  block-diag: w[5s+k, dim*s+d] = scale[k] * W[d, k]
    # sel_ref: [5*P, dim*P]  block-diag 0/1 selector (segment-sum for the norm)
    # b_ref:   [1, dim*P]    bias tiled P times
    # o_ref:   [T, dim*P]    bit-identical to row-major [T*P, dim]
    x = x_ref[...].astype(jnp.float32)

    # ||x||^2 of each original row, broadcast across that row's dim-wide output
    # group via the 0/1 block-diagonal selector (one skinny MXU contraction).
    sumsq = jnp.dot(x * x, sel_ref[...], precision=precision,
                    preferred_element_type=jnp.float32)
    # F.normalize: 1/max(||x||,1e-12) == rsqrt(max(||x||^2,1e-24))  (EUP slot).
    inv = lax.rsqrt(jnp.maximum(sumsq, 1e-24))

    # Linear(5, dim) with NormalizeScale folded in; inv applied once at the end.
    raw = jnp.dot(x, w_ref[...], precision=precision,
                  preferred_element_type=jnp.float32)
    o_ref[...] = (raw * inv + b_ref[...]).astype(o_ref.dtype)


def prepare_location_encoder_params(scale, weight, bias):
    """One-time parameter transform (do at model load, NOT per call).

    scale:  [1, 5] or [5]  NormalizeScale weight (ones * init_norm at init)
    weight: [dim, 5]       nn.Linear weight (PyTorch layout)
    bias:   [dim]          nn.Linear bias
    Returns (w_pack [5P, dim*P], sel_pack [5P, dim*P], b_pack [1, dim*P]) where
    P = 128 // dim when dim divides 128 (else 1):  P original rows are packed
    per kernel row so the output stores are 128-lane dense.
    """
    weight = jnp.asarray(weight, jnp.float32)
    bias = jnp.asarray(bias, jnp.float32)
    scale = jnp.asarray(scale, jnp.float32).reshape(1, -1)
    dim, f = weight.shape
    p = 128 // dim if (dim <= 128 and 128 % dim == 0) else 1

    w_eff_t = (weight * scale).T                                  # [f, dim]
    eye_p = jnp.eye(p, dtype=jnp.float32)
    w_pack = jnp.kron(eye_p, w_eff_t)                             # [f*p, dim*p]
    sel_pack = jnp.kron(eye_p, jnp.ones((f, dim), jnp.float32))   # [f*p, dim*p]
    b_pack = jnp.tile(bias.reshape(1, dim), (1, p))               # [1, dim*p]
    return w_pack, sel_pack, b_pack


def location_encoder(lfeats, w_pack, sel_pack, b_pack, *, tile_rows=8192,
                     out_dtype=jnp.float32,
                     precision=lax.Precision.HIGHEST):
    """lfeats: [N, 5] -> [N, dim].  Params from prepare_location_encoder_params.

    tile_rows: original rows per grid step (8192 is a good v5e/v6e default;
    sweep 16384-32768 on v7x but keep >= 2 grid steps for both TCs).
    """
    n, f = lfeats.shape
    fp, dp = w_pack.shape
    p = fp // f
    dim = dp // p

    # Pad N up to a multiple of the pack factor (no-op when N % P == 0).
    n_pad = ((n + p - 1) // p) * p
    x = lfeats if n_pad == n else jnp.pad(lfeats, ((0, n_pad - n), (0, 0)))

    # Free row-major reshape: [n_pad, f] -> [n_pad/P, f*P].  No transpose, no cast.
    nq = n_pad // p
    xq = x.reshape(nq, fp)

    # Packed-row tile: full extent when small, else aligned for f32/bf16 tiling.
    tq = max(tile_rows // p, 1)
    if tq >= nq:
        tq = nq
    else:
        tq = min(max(16, (tq // 16) * 16), nq)

    out_packed = pl.pallas_call(
        functools.partial(_location_encoder_kernel, precision),
        out_shape=jax.ShapeDtypeStruct((nq, dp), out_dtype),
        grid=(pl.cdiv(nq, tq),),
        in_specs=[
            pl.BlockSpec((tq, fp), lambda i: (i, 0)),   # x tile, contiguous DMA
            pl.BlockSpec((fp, dp), lambda i: (0, 0)),   # packed weight, resident
            pl.BlockSpec((fp, dp), lambda i: (0, 0)),   # norm selector, resident
            pl.BlockSpec((1, dp), lambda i: (0, 0)),    # bias, resident
        ],
        out_specs=pl.BlockSpec((tq, dp), lambda i: (i, 0)),   # 128-lane dense stores
        compiler_params=pltpu.CompilerParams(
            dimension_semantics=("parallel",),          # megacore sharding (v7x)
            vmem_limit_bytes=32 * 1024 * 1024,          # tiles only need ~MiBs
        ),
    )(xq, w_pack, sel_pack, b_pack)

    # Free reshape back to row-major [n_pad, dim]; drop the padded rows if any.
    out = out_packed.reshape(n_pad, dim)
    return out if n_pad == n else out[:n]


def reference(lfeats, scale, weight, bias):
    norm = jnp.sqrt(jnp.sum(lfeats * lfeats, axis=-1, keepdims=True))
    x_n = lfeats / jnp.maximum(norm, 1e-12)
    return jnp.einsum("nk,dk->nd", x_n * scale.reshape(1, -1), weight,
                      precision=lax.Precision.HIGHEST) + bias


if __name__ == "__main__":
    key = jax.random.PRNGKey(0)
    k_x, k_w, k_b, k_x2 = jax.random.split(key, 4)

    F = 5            # (x1, y1, x2, y2, area) location feature
    DIM = 32         # output embedding dim
    INIT_NORM = 20.0

    scale = jnp.ones((1, F), jnp.float32) * INIT_NORM            # NormalizeScale init
    weight = jax.random.normal(k_w, (DIM, F), jnp.float32) * 0.1
    bias = jax.random.normal(k_b, (DIM,), jnp.float32) * 0.01

    # One-time parameter transform (model load).
    w_pack, sel_pack, b_pack = prepare_location_encoder_params(scale, weight, bias)

    # Main check: multi-step grid (tile_rows=512 -> 2 pipelined grid steps).
    lfeats = jax.random.normal(k_x, (1024, F), jnp.float32)
    out = jax.block_until_ready(
        location_encoder(lfeats, w_pack, sel_pack, b_pack, tile_rows=512))
    ref = reference(lfeats, scale, weight, bias)
    assert out.shape == (1024, DIM)
    assert jnp.allclose(out, ref, atol=1e-3, rtol=1e-3), \
        float(jnp.max(jnp.abs(out - ref)))

    # Tiny / ragged batch: exercises N % P zero-padding and full-extent blocks.
    lfeats_s = jax.random.normal(k_x2, (10, F), jnp.float32)
    out_s = jax.block_until_ready(
        location_encoder(lfeats_s, w_pack, sel_pack, b_pack))
    ref_s = reference(lfeats_s, scale, weight, bias)
    assert out_s.shape == (10, DIM)
    assert jnp.allclose(out_s, ref_s, atol=1e-3, rtol=1e-3), \
        float(jnp.max(jnp.abs(out_s - ref_s)))

    print("KERNEL_OK")
</pallas_src>

<mosaic_0001>
module attributes {stable_mosaic.version = 11 : i64} {
  func.func @_location_encoder_kernel(%arg0: i32, %arg1: memref<128x20xf32, #tpu.memory_space<vmem>>, %arg2: memref<20x128xf32, #tpu.memory_space<vmem>>, %arg3: memref<20x128xf32, #tpu.memory_space<vmem>>, %arg4: memref<1x128xf32, #tpu.memory_space<vmem>>, %arg5: memref<128x128xf32, #tpu.memory_space<vmem>>) attributes {dimension_semantics = [#tpu.dimension_semantics<parallel>], iteration_bounds = array<i64: 2>, scalar_prefetch = 0 : i64, scratch_operands = 0 : i64, tpu.core_type = #tpu.core_type<tc>, window_params = [{transform_indices = @transform_0, window_bounds = array<i64: 128, 20>}, {pipeline_mode = #tpu.pipeline_mode<synchronous>, transform_indices = @transform_1, window_bounds = array<i64: 20, 128>}, {pipeline_mode = #tpu.pipeline_mode<synchronous>, transform_indices = @transform_2, window_bounds = array<i64: 20, 128>}, {pipeline_mode = #tpu.pipeline_mode<synchronous>, transform_indices = @transform_3, window_bounds = array<i64: 1, 128>}, {transform_indices = @transform_4, window_bounds = array<i64: 128, 128>}]} {
    %c0 = arith.constant 0 : index
    %c0_0 = arith.constant 0 : index
    %0 = vector.load %arg1[%c0, %c0_0] : memref<128x20xf32, #tpu.memory_space<vmem>>, vector<128x20xf32>
    %1 = arith.mulf %0, %0 : vector<128x20xf32>
    %c0_1 = arith.constant 0 : index
    %c0_2 = arith.constant 0 : index
    %2 = vector.load %arg3[%c0_1, %c0_2] : memref<20x128xf32, #tpu.memory_space<vmem>>, vector<20x128xf32>
    %cst = arith.constant dense<0.000000e+00> : vector<128x128xf32>
    %3 = tpu.matmul %1, %2, %cst {dimension_numbers = #tpu.dot_dimension_numbers<[1], [0], [0], [1], [0, 0, 1, 1], [], []>, precision = #tpu.contract_precision<fp32>} : vector<128x20xf32>, vector<20x128xf32>, vector<128x128xf32> -> vector<128x128xf32>
    %cst_3 = arith.constant 1.000000e-24 : f32
    %4 = vector.broadcast %cst_3 : f32 to vector<128x128xf32>
    %5 = arith.maximumf %3, %4 : vector<128x128xf32>
    %6 = math.rsqrt %5 : vector<128x128xf32>
    %c0_4 = arith.constant 0 : index
    %c0_5 = arith.constant 0 : index
    %7 = vector.load %arg2[%c0_4, %c0_5] : memref<20x128xf32, #tpu.memory_space<vmem>>, vector<20x128xf32>
    %cst_6 = arith.constant dense<0.000000e+00> : vector<128x128xf32>
    %8 = tpu.matmul %0, %7, %cst_6 {dimension_numbers = #tpu.dot_dimension_numbers<[1], [0], [0], [1], [0, 0, 1, 1], [], []>, precision = #tpu.contract_precision<fp32>} : vector<128x20xf32>, vector<20x128xf32>, vector<128x128xf32> -> vector<128x128xf32>
    %9 = arith.mulf %8, %6 : vector<128x128xf32>
    %c0_7 = arith.constant 0 : index
    %c0_8 = arith.constant 0 : index
    %10 = vector.load %arg4[%c0_7, %c0_8] : memref<1x128xf32, #tpu.memory_space<vmem>>, vector<1x128xf32>
    %11 = vector.broadcast %10 : vector<1x128xf32> to vector<128x128xf32>
    %12 = arith.addf %9, %11 : vector<128x128xf32>
    %c0_9 = arith.constant 0 : index
    %c0_10 = arith.constant 0 : index
    %13 = vector.load %arg5[%c0_9, %c0_10] : memref<128x128xf32, #tpu.memory_space<vmem>>, vector<128x128xf32>
    tpu.vector_store %arg5[%c0_9, %c0_10], %12 {strides = array<i32>} : memref<128x128xf32, #tpu.memory_space<vmem>>, vector<128x128xf32>,
    return
  }
  func.func @transform_0(%arg0: i32) -> (i32, i32) {
    %c0_i32 = arith.constant 0 : i32
    %c0_i32_0 = arith.constant 0 : i32
    return %arg0, %c0_i32 : i32, i32
  }
  func.func @transform_1(%arg0: i32) -> (i32, i32) {
    %c0_i32 = arith.constant 0 : i32
    %c0_i32_0 = arith.constant 0 : i32
    %c0_i32_1 = arith.constant 0 : i32
    return %c0_i32, %c0_i32_0 : i32, i32
  }
  func.func @transform_2(%arg0: i32) -> (i32, i32) {
    %c0_i32 = arith.constant 0 : i32
    %c0_i32_0 = arith.constant 0 : i32
    %c0_i32_1 = arith.constant 0 : i32
    return %c0_i32, %c0_i32_0 : i32, i32
  }
  func.func @transform_3(%arg0: i32) -> (i32, i32) {
    %c0_i32 = arith.constant 0 : i32
    %c0_i32_0 = arith.constant 0 : i32
    %c0_i32_1 = arith.constant 0 : i32
    return %c0_i32, %c0_i32_0 : i32, i32
  }
  func.func @transform_4(%arg0: i32) -> (i32, i32) {
    %c0_i32 = arith.constant 0 : i32
    %c0_i32_0 = arith.constant 0 : i32
    return %arg0, %c0_i32 : i32, i32
  }
}

</mosaic_0001>

<bundles_post_ra>
// kernel: tpu_custom_call.1
= control target key start
LH: loop header
LB: loop body
LE: loop exit
PB: predicated region body
PF: predicated region fallthrough
CT: control target
= control target key end

     0   :  { %9 = vsyncpa [#allocation3], 0  ;;  %s4673_s0 = inlined_call_operand.vmem [shape: f32[256,20], index: 0, kind: input, shape index: {}]   ;;  %s4674_s1 = inlined_call_operand.vmem [shape: f32[20,128], index: 1, kind: input, shape index: {}]   ;;  %s4675_s2 = inlined_call_operand.vmem [shape: f32[20,128], index: 2, kind: input, shape index: {}]   ;;  %s4676_s3 = inlined_call_operand.vmem [shape: f32[1,128], index: 3, kind: input, shape index: {}]   ;;  %s4677_s4 = inlined_call_operand.hbm [shape: f32[256,128], index: 4, kind: output, shape index: {}]  }
   0x1   :  { %11 = vsyncpa [#allocation3 + $0x1], 0  ;;  %s3503_s15 = smov 0   ;;  %s3505_s16 = smov 0  }
   0x2   :  { %s3507_s17 = smov 0   ;;  %s3509_s18 = smov 0  }
   0x3 LB: > { %s3524_s19 = sadd.s32 4294967295, %s3473_s18   ;;  %s2738_s20 = sadd.s32 4294967294, %s3473_s18   ;;  %s3473_s18 = sphi %s3509_s18, %s4762_s18   ;;  %s3469_s17 = sphi %s3507_s17, %s4761_s17   ;;  %s3465_s16 = sphi %s3505_s16, %s4760_s16   ;;  %s3461_s15 = sphi %s3503_s15, %s4759_s15  }
   0x4   : > { %s3528_s21 = sadd.s32 1, %s3473_s18   ;;  %s113_s22 = sadd.s32 1, %s3469_s17 }
   0x5   : > { %s110_s23 = ssub.s32 %s3473_s18, %s3528_s21  ;;  %p123_p0 = scmp.ne.s32.totalorder %s3469_s17, %s3465_s16 }
   0x6   : > { %p111_p1 = scmp.eq.s32.totalorder %s110_s23, 0  ;;  %p124_p2 = scmp.eq.s32.totalorder %s3524_s19, 1 }
   0x7   : > { %p129_p3 = scmp.ne.s32.totalorder %s3465_s16, %s3461_s15  ;;  %p130_p4 = scmp.eq.s32.totalorder %s2738_s20, 1 }
   0x8   : > { %s3539_s24 = scalar_select %p111_p1, %s3469_s17, %s113_s22  }
   0x9   : > { %p3541_p5 = por %p124_p2, %p123_p0  ;;  %p3545_p6 = por %p130_p4, %p129_p3 }
   0xa   : > { %p2741_p7 = scmp.ge.s32.totalorder %s3473_s18, 1  ;;  %p166_p8 = scmp.lt.s32.totalorder %s3473_s18, 3 }
   0xc   : > { %p167_p9 = pnand %p2741_p7, %p166_p8 }
   0xe   : > { %170 = sbr.rel (%p167_p9) target bundleno = 446 (0x1be), region = 36 }
  0x13   : > { %v233_v0 = vld [vmem:[%s4675_s2 + $0x10] sm:$0xf]  ;;  %vm283_vm0 = vcmask 1043456   ;;  %v232_v1 = vld [vmem:[%s4675_s2 + $0x8] sm:$0xff]  ;;  %v231_v2 = vld [vmem:[%s4675_s2] sm:$0xff]  ;;  %s2743_s7 = sshll.u32 %s3524_s19, 4 }
  0x14   : > { %v285_v3 = vsel %vm283_vm0, %v233_v0, 0  ;;  %v3562_v4 = vand.u32 4294901760, %v232_v1  ;;  %v3564_v5 = vand.u32 4294901760, %v231_v2  ;;  %p193_p10 = scmp.lt.s32.totalorder %s2743_s7, 31  ;;  %vm234_vm1 = vcmask 162816   ;;  %s189_s27 = sand.u32 1, %s3465_s16  }
  0x15   : > { %v3566_v6 = vand.u32 4294901760, %v285_v3  ;;  %s4532_s28 = sshll.u32 %s189_s27, 7  ;;  %s2751_s6 = sshll.u32 %s3524_s19, 11 }
  0x16   : > { %v3569_v7 = vsub.f32 %v232_v1, %v3562_v4  ;;  %v3572_v8 = vsub.f32 %v231_v2, %v3564_v5  ;;  %s4764_s7 = smov (!%p193_p10, %s2743_s7), 31  ;;  %s4555_s5 = scalar_lea.vmem [#allocation2], %s4532_s28 }
  0x17   : > { %2980 = vmatprep.subr.mxu0 %v3566_v6  ;;  %v3576_v9 = vsub.f32 %v285_v3, %v3566_v6  ;;  %s2744_s8 = sshll.u32 %s4764_s7, 3  ;;  %s2676_s7 = sshll.u32 %s4555_s5, 4  ;;  %s4626_s7 = int_to_ptr.vmem [resolvable:$true] %s2676_s7 }
  0x18   : > { %2981 = vmatpush3.msra.mxu0 %v3566_v6  ;;  %v3580_v10 = vand.u32 4294901760, %v3569_v7  ;;  %v3583_v11 = vand.u32 4294901760, %v3572_v8  ;;  %s3592_s11 = scalar_lea.vmem %s4673_s0, %s2744_s8  ;;  %s4624_s10 = scalar_lea.hbm %s4677_s4, %s2751_s6 }
  0x19   : > { %v3586_v12 = vand.u32 4294901760, %v3576_v9  ;;  %2982 = vmatprep.subr.mxu0 %v3562_v4  ;;  %v3600_v15 = vld [vmem:[%s3592_s11] sm:$0xff]  ;;  %v200_v16 = vld [vmem:[%s3592_s11 + $0x8] sm:$0xff]  ;;  %v3604_v17 = vld [vmem:[%s3592_s11 + $0x10] sm:$0xff]  ;;  %s4633_s19 = scalar_lea.sflag [#allocation3], %s189_s27  ;;  %s3475_s12 = smov [#allocation2]  }
  0x1a   : > { %2983 = vmatpush3.msra.mxu0 %v3562_v4  ;;  %v552_v13 = vsub.f32 %v3569_v7, %v3580_v10  ;;  %v559_v14 = vsub.f32 %v3572_v8, %v3583_v11  ;;  %v215_v19 = vmul.f32 %v3600_v15, %v3600_v15  ;;  %v216_v20 = vmul.f32 %v200_v16, %v200_v16  ;;  %v3615_v22 = vld [vmem:[%s3592_s11 + $0x18] sm:$0xff]  ;;  %v3621_v25 = vld [vmem:[%s3592_s11 + $0x20] sm:$0xff]  ;;  %v3624_v26 = vld [vmem:[%s3592_s11 + $0x28] sm:$0xff]  ;;  %s3417_s13 = sshll.u32 %s3475_s12, 4  ;;  %s3418_s13 = int_to_ptr.vmem [resolvable:$false] %s3417_s13 }
  0x1b   : > { %v545_v18 = vsub.f32 %v3576_v9, %v3586_v12  ;;  %2984 = vmatprep.subr.mxu0 %v3564_v5  ;;  %v3612_v21 = vsel %vm234_vm1, %v200_v16, 0  ;;  %v217_v24 = vmul.f32 %v3604_v17, %v3604_v17  ;;  %v218_v30 = vmul.f32 %v3615_v22, %v3615_v22  ;;  %v3632_v31 = vld [vmem:[%s3592_s11 + $0x30] sm:$0xff]  ;;  %v3640_v36 = vld [vmem:[%s3592_s11 + $0x38] sm:$0xff]  ;;  %v3702_v1 = vld [vmem:[%s3592_s11 + $0x40] sm:$0xff]  ;;  %s3419_s14 = scalar_lea.vmem %s3418_s13, 4096  ;;  %p3420_p0 = scmp.lt.s32.totalorder %s4626_s7, %s3418_s13 }
  0x1c   : > { %4700 = vst [vmem:[#allocation5_spill] sm:$0xff] %v3612_v21  ;;  %v553_v23 = vand.u32 4294901760, %v552_v13  ;;  %2985 = vmatpush3.msra.mxu0 %v3564_v5  ;;  %v236_v28 = vsel %vm234_vm1, %v215_v19, 0  ;;  %v239_v29 = vsel %vm234_vm1, %v216_v20, 0  ;;  %v560_v32 = vand.u32 4294901760, %v559_v14  ;;  %v3705_v2 = vld [vmem:[%s3592_s11 + $0x48] sm:$0xff] }
  0x1d   : > { %v546_v27 = vand.u32 4294901760, %v545_v18  ;;  %3040 = vmatprep.subr.mxu0 %v3576_v9  ;;  %v3634_v33 = vand.u32 4294901760, %v236_v28  ;;  %v3636_v34 = vand.u32 4294901760, %v239_v29  ;;  %v242_v35 = vsel %vm234_vm1, %v217_v24, 0  ;;  %v3714_v18 = vld [vmem:[%s3592_s11 + $0x50] sm:$0xff] }
  0x1e   : > { %v3642_v37 = vand.u32 4294901760, %v242_v35  ;;  %v245_v38 = vsel %vm234_vm1, %v218_v30, 0  ;;  %v219_v39 = vmul.f32 %v3621_v25, %v3621_v25  ;;  %v220_v40 = vmul.f32 %v3624_v26, %v3624_v26 }
  0x1f   : > { %3010 = vmatprep.subr.mxu1 %v546_v27  ;;  %v3650_v41 = vsub.f32 %v236_v28, %v3634_v33  ;;  %3016 = vmatprep.mubr.f32.mxu1 %v3634_v33  ;;  %v3654_v42 = vsub.f32 %v239_v29, %v3636_v34  ;;  %v3656_v43 = vand.u32 4294901760, %v245_v38  ;;  %v221_v44 = vmul.f32 %v3632_v31, %v3632_v31 }
  0x20   : > { %3011 = vmatpush3.msra.mxu1 %v546_v27  ;;  %v3661_v45 = vsub.f32 %v242_v35, %v3642_v37  ;;  %v248_v46 = vsel %vm234_vm1, %v219_v39, 0  ;;  %v251_v47 = vsel %vm234_vm1, %v220_v40, 0  ;;  %v222_v48 = vmul.f32 %v3640_v36, %v3640_v36  ;;  %v3725_v27 = vld [vmem:[%s3592_s11 + $0x58] sm:$0xff] }
  0x21   : > { %3012 = vmatprep.subr.mxu1 %v553_v23  ;;  %v4686_v49 = vand.u32 4294901760, %v3650_v41  ;;  %v4685_v50 = vand.u32 4294901760, %v3654_v42  ;;  %v3670_v51 = vsub.f32 %v245_v38, %v3656_v43  ;;  %v3672_v52 = vand.u32 4294901760, %v248_v46 }
  0x22   : > { %3013 = vmatpush3.msra.mxu1 %v553_v23  ;;  %v4683_v53 = vand.u32 4294901760, %v3661_v45  ;;  %v3675_v54 = vand.u32 4294901760, %v251_v47  ;;  %v254_v55 = vsel %vm234_vm1, %v221_v44, 0  ;;  %v257_v56 = vsel %vm234_vm1, %v222_v48, 0  ;;  %v3744_v44 = vld [vmem:[%s3592_s11 + $0x60] sm:$0xff] }
  0x23   : > { %3014 = vmatprep.subr.mxu1 %v560_v32  ;;  %v358_v57 = vsub.f32 %v3650_v41, %v4686_v49  ;;  %v368_v58 = vsub.f32 %v3654_v42, %v4685_v50  ;;  %v4682_v59 = vand.u32 4294901760, %v3670_v51  ;;  %v3687_v60 = vsub.f32 %v248_v46, %v3672_v52 }
  0x24   : > { %3015 = vmatpush3.msra.mxu1 %v560_v32  ;;  %v378_v61 = vsub.f32 %v3661_v45, %v4683_v53  ;;  %v3695_v62 = vsub.f32 %v251_v47, %v3675_v54  ;;  %v3697_v63 = vand.u32 4294901760, %v254_v55  ;;  %v3699_v0 = vand.u32 4294901760, %v257_v56 }
  0x25   : > { %3017 = vmatmul.mubr.f32.vlgmr.msra.gmra.mxu1 %v3636_v34  ;;  %3070 = vmatprep.subr.mxu1 %v3566_v6  ;;  %v359_v3 = vand.u32 4294901760, %v358_v57  ;;  %v369_v13 = vand.u32 4294901760, %v368_v58  ;;  %v388_v14 = vsub.f32 %v3670_v51, %v4682_v59  ;;  %v4681_v16 = vand.u32 4294901760, %v3687_v60 }
  0x26   : > { %3071 = vmatpush3.msra.mxu1 %v3566_v6  ;;  %3019 = vmatprep.mubr.f32.mxu1 %v3642_v37  ;;  %v379_v19 = vand.u32 4294901760, %v378_v61  ;;  %v4680_v20 = vand.u32 4294901760, %v3695_v62  ;;  %v3718_v23 = vsub.f32 %v254_v55, %v3697_v63  ;;  %v3721_v24 = vsub.f32 %v257_v56, %v3699_v0  ;;  %v3762_v61 = vld [vmem:[%s3592_s11 + $0x68] sm:$0xff] }
  0x27   : > { %3072 = vmatprep.subr.mxu1 %v3562_v4  ;;  %2986 = vmatprep.mubr.f32.mxu0 %v359_v3  ;;  %v389_v28 = vand.u32 4294901760, %v388_v14  ;;  %v398_v29 = vsub.f32 %v3687_v60, %v4681_v16  ;;  %v223_v30 = vmul.f32 %v3702_v1, %v3702_v1  ;;  %v224_v32 = vmul.f32 %v3705_v2, %v3705_v2 }
  0x28   : > { %3073 = vmatpush3.msra.mxu1 %v3562_v4  ;;  %2987 = vmatmul.mubr.f32.vlgmr.msra.gmra.mxu0 %v369_v13  ;;  %v408_v35 = vsub.f32 %v3695_v62, %v4680_v20  ;;  %v4679_v38 = vand.u32 4294901760, %v3718_v23  ;;  %v4678_v39 = vand.u32 4294901760, %v3721_v24  ;;  %v225_v40 = vmul.f32 %v3714_v18, %v3714_v18 }
  0x29   : > { %3020 = vmatmul.mubr.f32.gmra.mxu1 %v3656_v43  ;;  %3041 = vmatpush3.msra.mxu0 %v3576_v9  ;;  %v399_v46 = vand.u32 4294901760, %v398_v29  ;;  %v260_v47 = vsel %vm234_vm1, %v223_v30, 0  ;;  %v263_v48 = vsel %vm234_vm1, %v224_v32, 0  ;;  %v226_v55 = vmul.f32 %v3725_v27, %v3725_v27  ;;  %v3773_v29 = vld [vmem:[%s3592_s11 + $0x70] sm:$0xff] }
  0x2a   : > { %2989 = vmatprep.mubr.f32.mxu0 %v379_v19  ;;  %3022 = vmatprep.mubr.f32.mxu1 %v3672_v52  ;;  %v409_v56 = vand.u32 4294901760, %v408_v35  ;;  %v418_v57 = vsub.f32 %v3718_v23, %v4679_v38  ;;  %v428_v9 = vsub.f32 %v3721_v24, %v4678_v39  ;;  %v3759_v58 = vand.u32 4294901760, %v260_v47 }
  0x2b   : > { %3042 = vmatprep.subr.mxu0 %v3569_v7  ;;  %v3765_v3 = vand.u32 4294901760, %v263_v48  ;;  %v266_v13 = vsel %vm234_vm1, %v225_v40, 0  ;;  %v269_v14 = vsel %vm234_vm1, %v226_v55, 0  ;;  %v227_v19 = vmul.f32 %v3744_v44, %v3744_v44  ;;  %3074 = vmatprep.subr.mxu1 %v3564_v5  ;;  %v3782_v40 = vld [vmem:[%s3592_s11 + $0x78] sm:$0xff]  ;;  %s3413_s11 = scalar_lea.vmem %s4626_s7, 2048 }
  0x2c   : > { %4701 = vst [vmem:[#allocation6_spill] sm:$0xff] %v3759_v58  ;;  %3043 = vmatpush3.msra.mxu0 %v3569_v7  ;;  %v419_v30 = vand.u32 4294901760, %v418_v57  ;;  %v429_v32 = vand.u32 4294901760, %v428_v9  ;;  %v3777_v7 = vsub.f32 %v260_v47, %v3759_v58  ;;  %v3779_v35 = vand.u32 4294901760, %v266_v13  ;;  %3075 = vmatpush3.msra.mxu1 %v3564_v5  ;;  %p3414_p11 = scmp.ne.s32.totalorder %s4626_s7, %s3413_s11  ;;  %p3421_p1 = scmp.lt.s32.totalorder %s3419_s14, %s3413_s11 }
  0x2d   : > { %2990 = vmatmul.mubr.f32.gmra.mxu0 %v389_v28  ;;  %3023 = vmatmul.mubr.f32.gmra.mxu1 %v3675_v54  ;;  %v3786_v55 = vsub.f32 %v263_v48, %v3765_v3  ;;  %v3788_v39 = vand.u32 4294901760, %v269_v14  ;;  %v272_v28 = vsel %vm234_vm1, %v227_v19, 0  ;;  %v228_v57 = vmul.f32 %v3762_v61, %v3762_v61 }
  0x2e   : > { %4702 = vst [vmem:[#allocation7_spill] sm:$0xff] %v3779_v35  ;;  %2992 = vmatprep.mubr.f32.mxu0 %v399_v46  ;;  %3025 = vmatprep.mubr.f32.mxu1 %v3697_v63  ;;  %v4684_v47 = vand.u32 4294901760, %v3777_v7  ;;  %v3795_v9 = vsub.f32 %v266_v13, %v3779_v35  ;;  %v3798_v46 = vand.u32 4294901760, %v272_v28  ;;  %v229_v48 = vmul.f32 %v3773_v29, %v3773_v29  ;;  %p3415_p12 = pnand %p3414_p11, %p3541_p5  ;;  %p3422_p2 = por %p3421_p1, %p3420_p0 }
  0x2f   : > { %3044 = vmatprep.subr.mxu0 %v3572_v8  ;;  %v4688_v38 = vand.u32 4294901760, %v3786_v55  ;;  %v3805_v19 = vsub.f32 %v269_v14, %v3788_v39  ;;  %v275_v20 = vsel %vm234_vm1, %v228_v57, 0  ;;  %v230_v13 = vmul.f32 %v3782_v40, %v3782_v40  ;;  %3130 = vmatprep.subr.mxu1 %v3566_v6 }
  0x30   : > { %3045 = vmatpush3.msra.mxu0 %v3572_v8  ;;  %v438_v16 = vsub.f32 %v3777_v7, %v4684_v47  ;;  %v4689_v59 = vand.u32 4294901760, %v3795_v9  ;;  %v3818_v14 = vsub.f32 %v272_v28, %v3798_v46  ;;  %v3820_v8 = vand.u32 4294901760, %v275_v20  ;;  %p3416_p13 = pneg %p3415_p12 }
  0x31   : > { %2993 = vmatmul.mubr.f32.gmra.mxu0 %v409_v56  ;;  %3026 = vmatmul.mubr.f32.gmra.mxu1 %v3699_v0  ;;  %v448_v56 = vsub.f32 %v3786_v55, %v4688_v38  ;;  %v4692_v57 = vand.u32 4294901760, %v3805_v19  ;;  %v278_v53 = vsel %vm234_vm1, %v229_v48, 0  ;;  %v281_v47 = vsel %vm234_vm1, %v230_v13, 0 }
  0x32   : > { %2995 = vmatprep.mubr.f32.mxu0 %v419_v30  ;;  %3028 = vmatprep.mubr.f32.mxu1 %v3759_v58  ;;  %v439_v50 = vand.u32 4294901760, %v438_v16  ;;  %v458_v28 = vsub.f32 %v3795_v9, %v4689_v59  ;;  %v4693_v49 = vand.u32 4294901760, %v3818_v14  ;;  %v3834_v30 = vsub.f32 %v275_v20, %v3820_v8  ;;  %p3423_p3 = pnand %p3422_p2, %p3416_p13 }
  0x33   : > { %3100 = vmatprep.subr.mxu0 %v3586_v12  ;;  %v3837_v21 = vand.u32 4294901760, %v278_v53  ;;  %v3839_v38 = vand.u32 4294901760, %v281_v47  ;;  %v449_v48 = vand.u32 4294901760, %v448_v56  ;;  %v468_v16 = vsub.f32 %v3805_v19, %v4692_v57  ;;  %v1438_v56 = vld [vmem:[%s4674_s1 + $0x10] sm:$0xf] }
  0x34   : > { %v4696_v13 = vand.u32 4294901760, %v3834_v30  ;;  %v459_v59 = vand.u32 4294901760, %v458_v28  ;;  %v478_v20 = vsub.f32 %v3818_v14, %v4693_v49  ;;  %v1488_v49 = vsel %vm283_vm0, %v1438_v56, 0 }
  0x35   : > { %2996 = vmatmul.mubr.f32.gmra.mxu0 %v429_v32  ;;  %3029 = vmatmul.mubr.f32.gmra.mxu1 %v3765_v3  ;;  %v3851_v58 = vsub.f32 %v278_v53, %v3837_v21  ;;  %v3854_v32 = vsub.f32 %v281_v47, %v3839_v38  ;;  %v469_v28 = vand.u32 4294901760, %v468_v16  ;;  %v3880_v16 = vsel %vm234_vm1, %v3615_v22, 0 }
  0x36   : > { %2998 = vmatprep.mubr.f32.mxu0 %v439_v50  ;;  %3031 = vmatprep.mubr.f32.mxu1 %v3779_v35  ;;  %v3862_v50 = vsel %vm234_vm1, %v3600_v15, 0  ;;  %v488_v53 = vsub.f32 %v3834_v30, %v4696_v13  ;;  %v479_v35 = vand.u32 4294901760, %v478_v20  ;;  %v3884_v13 = vsel %vm234_vm1, %v3621_v25, 0 }
  0x37   : > { %v497_v57 = vand.u32 4294901760, %v3851_v58  ;;  %v4697_v47 = vand.u32 4294901760, %v3854_v32  ;;  %v3899_v25 = vsel %vm234_vm1, %v3632_v31, 0  ;;  %v3917_v31 = vsel %vm234_vm1, %v3705_v2, 0 }
  0x38   : > { %v489_v20 = vand.u32 4294901760, %v488_v53  ;;  %v3906_v53 = vsel %vm234_vm1, %v3640_v36, 0  ;;  %v4704_v36 = vand.u32 4294901760, %v3654_v42  ;;  %v3935_v2 = vsel %vm234_vm1, %v3725_v27, 0 }
  0x39   : > { %2999 = vmatmul.mubr.f32.gmra.mxu0 %v449_v48  ;;  %3032 = vmatmul.mubr.f32.gmra.mxu1 %v3788_v39  ;;  %v498_v15 = vsub.f32 %v3851_v58, %v497_v57  ;;  %v3876_v48 = vsel %vm234_vm1, %v3604_v17, 0  ;;  %v508_v56 = vsub.f32 %v3854_v32, %v4697_v47  ;;  %v3894_v17 = vsel %vm234_vm1, %v3624_v26, 0 }
  0x3a   : > { %3001 = vmatprep.mubr.f32.mxu0 %v459_v59  ;;  %3034 = vmatprep.mubr.f32.mxu1 %v3798_v46  ;;  %v3886_v59 = vand.u32 4294901760, %v1488_v49  ;;  %v3910_v47 = vsel %vm234_vm1, %v3702_v1, 0  ;;  %v3926_v1 = vsel %vm234_vm1, %v3714_v18, 0  ;;  %v3949_v18 = vsel %vm234_vm1, %v3762_v61, 0 }
  0x3b   : > { %v499_v22 = vand.u32 4294901760, %v498_v15  ;;  %v509_v26 = vand.u32 4294901760, %v508_v56  ;;  %v4705_v15 = vand.u32 4294901760, %v3661_v45  ;;  %v3953_v27 = vsel %vm234_vm1, %v3773_v29, 0 }
  0x3d   : > { %3002 = vmatmul.mubr.f32.gmra.mxu0 %v469_v28  ;;  %3035 = vmatmul.mubr.f32.gmra.mxu1 %v3820_v8  ;;  %v3902_v28 = vsub.f32 %v1488_v49, %v3886_v59 }
  0x3e   : > { %3004 = vmatprep.mubr.f32.mxu0 %v479_v35  ;;  %3037 = vmatprep.mubr.f32.mxu1 %v3837_v21  ;;  %v4703_v35 = vand.u32 4294901760, %v3650_v41 }
  0x3f   : > { %v3920_v49 = vand.u32 4294901760, %v3902_v28 }
  0x41   : > { %3005 = vmatmul.mubr.f32.gmra.mxu0 %v489_v20  ;;  %3038 = vmatmul.mubr.f32.gmra.mxu1 %v3839_v38  ;;  %v3939_v20 = vsel %vm234_vm1, %v3744_v44, 0  ;;  %v3964_v44 = vsel %vm234_vm1, %v3782_v40, 0  ;;  %v4715_v40 = vand.u32 4294901760, %v3818_v14 }
  0x42   : > { %3007 = vmatprep.mubr.f32.mxu0 %v499_v22  ;;  %3076 = vmatprep.mubr.f32.mxu1 %v4703_v35  ;;  %v4716_v22 = vand.u32 4294901760, %v3834_v30 }
  0x45   : > { %3008 = vmatmul.mubr.f32.gmra.mxu0 %v509_v26  ;;  %3077 = vmatmul.mubr.f32.vlgmr.msra.gmra.mxu1 %v4704_v36  ;;  %v4717_v26 = vand.u32 4294901760, %v3854_v32 }
  0x46   : > { %3046 = vmatprep.mubr.f32.mxu0 %v3650_v41  ;;  %3131 = vmatpush3.msra.mxu1 %v3566_v6  ;;  %v1748_v41 = vsub.f32 %v3902_v28, %v3920_v49  ;;  %v4706_v6 = vand.u32 4294901760, %v3670_v51 }
  0x47   : > { %3079 = vmatprep.mubr.f32.mxu1 %v4705_v15  ;;  %3132 = vmatprep.subr.mxu1 %v3562_v4  ;;  %v4101_v15 = vand.u32 4294901760, %v3899_v25 }
  0x48   : > { %3133 = vmatpush3.msra.mxu1 %v3562_v4  ;;  %v4707_v4 = vand.u32 4294901760, %v3687_v60 }
  0x49   : > { %3047 = vmatmul.mubr.f32.vlgmr.msra.gmra.mxu0 %v3654_v42  ;;  %3080 = vmatmul.mubr.f32.gmra.mxu1 %v4706_v6  ;;  %v1749_v42 = vand.u32 4294901760, %v1748_v41  ;;  %v4118_v6 = vand.u32 4294901760, %v3906_v53 }
  0x4a   : > { %3101 = vmatpush3.msra.mxu0 %v3586_v12  ;;  %3049 = vmatprep.mubr.f32.mxu0 %v3661_v45  ;;  %v4708_v12 = vand.u32 4294901760, %v3695_v62  ;;  %v4709_v45 = vand.u32 4294901760, %v3718_v23 }
  0x4b   : > { %3082 = vmatprep.mubr.f32.mxu1 %v4707_v4  ;;  %3102 = vmatprep.subr.mxu0 %v3580_v10 }
  0x4c   : > { %3103 = vmatpush3.msra.mxu0 %v3580_v10  ;;  %3134 = vmatprep.subr.mxu1 %v3564_v5  ;;  %v1437_v10 = vld [vmem:[%s4674_s1 + $0x8] sm:$0xff] }
  0x4d   : > { %3050 = vmatmul.mubr.f32.gmra.mxu0 %v3670_v51  ;;  %3083 = vmatmul.mubr.f32.gmra.mxu1 %v4708_v12  ;;  %v4710_v51 = vand.u32 4294901760, %v3721_v24  ;;  %v4137_v12 = vand.u32 4294901760, %v3910_v47 }
  0x4e   : > { %3052 = vmatprep.mubr.f32.mxu0 %v3687_v60  ;;  %3085 = vmatprep.mubr.f32.mxu1 %v4709_v45  ;;  %v4711_v60 = vand.u32 4294901760, %v3777_v7 }
  0x4f   : > { %3104 = vmatprep.subr.mxu0 %v3583_v11  ;;  %3135 = vmatpush3.msra.mxu1 %v3564_v5  ;;  %v3985_v5 = vand.u32 4294901760, %v1437_v10 }
  0x50   : > { %3105 = vmatpush3.msra.mxu0 %v3583_v11  ;;  %3190 = vmatprep.subr.mxu1 %v1749_v42  ;;  %v4712_v11 = vand.u32 4294901760, %v3786_v55 }
  0x51   : > { %3053 = vmatmul.mubr.f32.gmra.mxu0 %v3695_v62  ;;  %3086 = vmatmul.mubr.f32.gmra.mxu1 %v4710_v51  ;;  %v1436_v62 = vld [vmem:[%s4674_s1] sm:$0xff]  ;;  %v3997_v61 = vsub.f32 %v1437_v10, %v3985_v5 }
  0x52   : > { %3055 = vmatprep.mubr.f32.mxu0 %v3718_v23  ;;  %3088 = vmatprep.mubr.f32.mxu1 %v4711_v60  ;;  %v4713_v23 = vand.u32 4294901760, %v3795_v9  ;;  %v3999_v29 = vand.u32 4294901760, %v1436_v62  ;;  %v4151_v60 = vand.u32 4294901760, %v3917_v31 }
  0x53   : > { %3160 = vmatprep.subr.mxu0 %v3886_v59 }
  0x54   : > { %v4011_v56 = vsub.f32 %v1436_v62, %v3999_v29  ;;  %v4162_v62 = vand.u32 4294901760, %v3926_v1 }
  0x55   : > { %3056 = vmatmul.mubr.f32.gmra.mxu0 %v3721_v24  ;;  %3089 = vmatmul.mubr.f32.gmra.mxu1 %v4712_v11  ;;  %v4714_v24 = vand.u32 4294901760, %v3805_v19 }
  0x56   : > { %3058 = vmatprep.mubr.f32.mxu0 %v3777_v7  ;;  %3091 = vmatprep.mubr.f32.mxu1 %v4713_v23  ;;  %v4008_v7 = vand.u32 4294901760, %v3997_v61 }
  0x59   : > { %3059 = vmatmul.mubr.f32.gmra.mxu0 %v3786_v55  ;;  %3092 = vmatmul.mubr.f32.gmra.mxu1 %v4714_v24  ;;  %v1755_v55 = vsub.f32 %v3997_v61, %v4008_v7 }
  0x5a   : > { %3061 = vmatprep.mubr.f32.mxu0 %v3795_v9  ;;  %3094 = vmatprep.mubr.f32.mxu1 %v4715_v40  ;;  %v4022_v9 = vand.u32 4294901760, %v4011_v56 }
  0x5d   : > { %3062 = vmatmul.mubr.f32.gmra.mxu0 %v3805_v19  ;;  %3095 = vmatmul.mubr.f32.gmra.mxu1 %v4716_v22  ;;  %v1756_v19 = vand.u32 4294901760, %v1755_v55  ;;  %v4177_v22 = vsub.f32 %v3917_v31, %v4151_v60  ;;  %v4180_v55 = vand.u32 4294901760, %v3935_v2 }
  0x5e   : > { %3064 = vmatprep.mubr.f32.mxu0 %v3818_v14  ;;  %3097 = vmatprep.mubr.f32.mxu1 %v497_v57  ;;  %v1762_v14 = vsub.f32 %v4011_v56, %v4022_v9 }
  0x60   : > { %v1763_v57 = vand.u32 4294901760, %v1762_v14  ;;  %v4186_v14 = vsub.f32 %v3926_v1, %v4162_v62 }
  0x61   : > { %3065 = vmatmul.mubr.f32.gmra.mxu0 %v3834_v30  ;;  %3098 = vmatmul.mubr.f32.gmra.mxu1 %v4717_v26 }
  0x62   : > { %3067 = vmatprep.mubr.f32.mxu0 %v3851_v58  ;;  %3136 = vmatprep.mubr.f32.mxu1 %v3634_v33 }
  0x65   : > { %3068 = vmatmul.mubr.f32.gmra.mxu0 %v3854_v32  ;;  %3137 = vmatmul.mubr.f32.vlgmr.msra.gmra.mxu1 %v3636_v34 }
  0x66   : > { %3106 = vmatprep.mubr.f32.mxu0 %v3634_v33  ;;  %3191 = vmatpush3.msra.mxu1 %v1749_v42  ;;  %v4718_v33 = vld [vmem:[#allocation6_spill] sm:$0xff] }
  0x67   : > { %3139 = vmatprep.mubr.f32.mxu1 %v3642_v37  ;;  %3192 = vmatprep.subr.mxu1 %v1756_v19 }
  0x68   : > { %3193 = vmatpush3.msra.mxu1 %v1756_v19 }
  0x69   : > { %3107 = vmatmul.mubr.f32.vlgmr.msra.gmra.mxu0 %v3636_v34  ;;  %3140 = vmatmul.mubr.f32.gmra.mxu1 %v3656_v43  ;;  %v4054_v34 = vand.u32 4294901760, %v3862_v50 }
  0x6a   : > { %3161 = vmatpush3.msra.mxu0 %v3886_v59  ;;  %3109 = vmatprep.mubr.f32.mxu0 %v3642_v37  ;;  %v4719_v37 = vld [vmem:[#allocation5_spill] sm:$0xff] }
  0x6b   : > { %3142 = vmatprep.mubr.f32.mxu1 %v3672_v52  ;;  %3162 = vmatprep.subr.mxu0 %v3985_v5 }
  0x6c   : > { %3163 = vmatpush3.msra.mxu0 %v3985_v5  ;;  %3194 = vmatprep.subr.mxu1 %v1763_v57 }
  0x6d   : > { %3110 = vmatmul.mubr.f32.gmra.mxu0 %v3656_v43  ;;  %3143 = vmatmul.mubr.f32.gmra.mxu1 %v3675_v54  ;;  %v4058_v43 = vand.u32 4294901760, %v4719_v37 }
  0x6e   : > { %3112 = vmatprep.mubr.f32.mxu0 %v3672_v52  ;;  %3145 = vmatprep.mubr.f32.mxu1 %v3697_v63  ;;  %v4720_v52 = vld [vmem:[#allocation7_spill] sm:$0xff] }
  0x6f   : > { %3164 = vmatprep.subr.mxu0 %v3999_v29  ;;  %3195 = vmatpush3.msra.mxu1 %v1763_v57  ;;  %v4073_v58 = vsub.f32 %v4719_v37, %v4058_v43  ;;  %v4189_v57 = vand.u32 4294901760, %v3939_v20  ;;  %v4202_v37 = vsub.f32 %v3935_v2, %v4180_v55 }
  0x70   : > { %3165 = vmatpush3.msra.mxu0 %v3999_v29  ;;  %3250 = vmatprep.subr.mxu1 %v3886_v59 }
  0x71   : > { %3113 = vmatmul.mubr.f32.gmra.mxu0 %v3675_v54  ;;  %3146 = vmatmul.mubr.f32.gmra.mxu1 %v3699_v0  ;;  %v4066_v54 = vsub.f32 %v3862_v50, %v4054_v34  ;;  %v4088_v50 = vand.u32 4294901760, %v3884_v13  ;;  %v1570_v35 = vand.u32 4294901760, %v4073_v58 }
  0x72   : > { %3115 = vmatprep.mubr.f32.mxu0 %v3697_v63  ;;  %3148 = vmatprep.mubr.f32.mxu1 %v4718_v33  ;;  %v4069_v63 = vand.u32 4294901760, %v3876_v48 }
  0x73   : > { %3220 = vmatprep.subr.mxu0 %v3902_v28  ;;  %v1560_v30 = vand.u32 4294901760, %v4066_v54  ;;  %v4111_v41 = vsub.f32 %v3884_v13, %v4088_v50  ;;  %v4128_v13 = vsub.f32 %v3899_v25, %v4101_v15  ;;  %v4142_v25 = vsub.f32 %v3906_v53, %v4118_v6 }
  0x74   : > { %v4085_v32 = vsub.f32 %v3876_v48, %v4069_v63  ;;  %v4159_v53 = vsub.f32 %v3910_v47, %v4137_v12 }
  0x75   : > { %3116 = vmatmul.mubr.f32.gmra.mxu0 %v3699_v0  ;;  %3149 = vmatmul.mubr.f32.gmra.mxu1 %v3765_v3  ;;  %v4078_v0 = vand.u32 4294901760, %v3880_v16  ;;  %v1561_v48 = vsub.f32 %v4066_v54, %v1560_v30  ;;  %v1600_v42 = vand.u32 4294901760, %v4111_v41  ;;  %v1620_v51 = vand.u32 4294901760, %v4128_v13 }
  0x76   : > { %3118 = vmatprep.mubr.f32.mxu0 %v4718_v33  ;;  %3151 = vmatprep.mubr.f32.mxu1 %v4720_v52  ;;  %v1630_v24 = vand.u32 4294901760, %v4142_v25  ;;  %v1640_v19 = vand.u32 4294901760, %v4159_v53  ;;  %v1650_v33 = vand.u32 4294901760, %v4177_v22 }
  0x77   : > { %v4098_v36 = vsub.f32 %v3880_v16, %v4078_v0  ;;  %v1621_v47 = vsub.f32 %v4128_v13, %v1620_v51 }
  0x79   : > { %3119 = vmatmul.mubr.f32.gmra.mxu0 %v3765_v3  ;;  %3152 = vmatmul.mubr.f32.gmra.mxu1 %v3788_v39  ;;  %v4091_v3 = vand.u32 4294901760, %v3894_v17  ;;  %v1590_v4 = vand.u32 4294901760, %v4098_v36  ;;  %v1622_v1 = vand.u32 4294901760, %v1621_v47 }
  0x7a   : > { %3121 = vmatprep.mubr.f32.mxu0 %v4720_v52  ;;  %3154 = vmatprep.mubr.f32.mxu1 %v3798_v46  ;;  %v4205_v52 = vand.u32 4294901760, %v3949_v18 }
  0x7b   : > { %v4115_v16 = vsub.f32 %v3894_v17, %v4091_v3  ;;  %v1562_v17 = vand.u32 4294901760, %v1561_v48  ;;  %v1591_v10 = vsub.f32 %v4098_v36, %v1590_v4  ;;  %v1660_v48 = vand.u32 4294901760, %v4186_v14 }
  0x7d   : > { %3122 = vmatmul.mubr.f32.gmra.mxu0 %v3788_v39  ;;  %3155 = vmatmul.mubr.f32.gmra.mxu1 %v3820_v8  ;;  %v1580_v39 = vand.u32 4294901760, %v4085_v32  ;;  %v1610_v45 = vand.u32 4294901760, %v4115_v16  ;;  %v1592_v40 = vand.u32 4294901760, %v1591_v10  ;;  %v4233_v10 = vand.u32 4294901760, %v3964_v44 }
  0x7e   : > { %3124 = vmatprep.mubr.f32.mxu0 %v3798_v46  ;;  %3157 = vmatprep.mubr.f32.mxu1 %v3837_v21  ;;  %v1571_v46 = vsub.f32 %v4073_v58, %v1570_v35 }
  0x7f   : > { %v1611_v23 = vsub.f32 %v4115_v16, %v1610_v45 }
  0x81   : > { %3125 = vmatmul.mubr.f32.gmra.mxu0 %v3820_v8  ;;  %3158 = vmatmul.mubr.f32.gmra.mxu1 %v3839_v38  ;;  %v1581_v8 = vsub.f32 %v4085_v32, %v1580_v39  ;;  %v1612_v31 = vand.u32 4294901760, %v1611_v23 }
  0x82   : > { %3127 = vmatprep.mubr.f32.mxu0 %v3837_v21  ;;  %3196 = vmatprep.mubr.f32.mxu1 %v4054_v34  ;;  %v1572_v21 = vand.u32 4294901760, %v1571_v46  ;;  %v4214_v46 = vsub.f32 %v3939_v20, %v4189_v57  ;;  %v1651_v20 = vsub.f32 %v4177_v22, %v1650_v33 }
  0x83   : > { %v1582_v11 = vand.u32 4294901760, %v1581_v8  ;;  %v1670_v8 = vand.u32 4294901760, %v4202_v37 }
  0x85   : > { %3128 = vmatmul.mubr.f32.gmra.mxu0 %v3839_v38  ;;  %3197 = vmatmul.mubr.f32.vlgmr.msra.gmra.mxu1 %v4058_v43  ;;  %v1601_v38 = vsub.f32 %v4111_v41, %v1600_v42 }
  0x86   : > { %3166 = vmatprep.mubr.f32.mxu0 %v1562_v17  ;;  %3251 = vmatpush3.msra.mxu1 %v3886_v59  ;;  %v4217_v17 = vand.u32 4294901760, %v3953_v27 }
  0x87   : > { %3199 = vmatprep.mubr.f32.mxu1 %v4069_v63  ;;  %3252 = vmatprep.subr.mxu1 %v3985_v5  ;;  %v1602_v26 = vand.u32 4294901760, %v1601_v38  ;;  %v1680_v38 = vand.u32 4294901760, %v4214_v46 }
  0x88   : > { %3253 = vmatpush3.msra.mxu1 %v3985_v5  ;;  %v4242_v23 = vsub.f32 %v3953_v27, %v4217_v17 }
  0x89   : > { %3167 = vmatmul.mubr.f32.vlgmr.msra.gmra.mxu0 %v1572_v21  ;;  %3200 = vmatmul.mubr.f32.gmra.mxu1 %v4078_v0  ;;  %v4230_v21 = vsub.f32 %v3949_v18, %v4205_v52  ;;  %v1652_v18 = vand.u32 4294901760, %v1651_v20  ;;  %v1681_v27 = vsub.f32 %v4214_v46, %v1680_v38 }
  0x8a   : > { %3221 = vmatpush3.msra.mxu0 %v3902_v28  ;;  %3169 = vmatprep.mubr.f32.mxu0 %v1582_v11  ;;  %v1631_v28 = vsub.f32 %v4142_v25, %v1630_v24  ;;  %v1661_v11 = vsub.f32 %v4186_v14, %v1660_v48 }
  0x8b   : > { %3202 = vmatprep.mubr.f32.mxu1 %v4088_v50  ;;  %3222 = vmatprep.subr.mxu0 %v3997_v61  ;;  %v1690_v47 = vand.u32 4294901760, %v4230_v21 }
  0x8c   : > { %3223 = vmatpush3.msra.mxu0 %v3997_v61  ;;  %3254 = vmatprep.subr.mxu1 %v3999_v29  ;;  %v1641_v61 = vsub.f32 %v4159_v53, %v1640_v19  ;;  %v1632_v2 = vand.u32 4294901760, %v1631_v28  ;;  %v1700_v28 = vand.u32 4294901760, %v4242_v23 }
  0x8d   : > { %3170 = vmatmul.mubr.f32.gmra.mxu0 %v1592_v40  ;;  %3203 = vmatmul.mubr.f32.gmra.mxu1 %v4091_v3  ;;  %v1671_v40 = vsub.f32 %v4202_v37, %v1670_v8 }
  0x8e   : > { %3172 = vmatprep.mubr.f32.mxu0 %v1602_v26  ;;  %3205 = vmatprep.mubr.f32.mxu1 %v4101_v15  ;;  %v4252_v26 = vsub.f32 %v3964_v44, %v4233_v10  ;;  %v1682_v44 = vand.u32 4294901760, %v1681_v27  ;;  %v1701_v20 = vsub.f32 %v4242_v23, %v1700_v28 }
  0x8f   : > { %3224 = vmatprep.subr.mxu0 %v4011_v56  ;;  %3255 = vmatpush3.msra.mxu1 %v3999_v29 }
  0x90   : > { %3225 = vmatpush3.msra.mxu0 %v4011_v56  ;;  %3310 = vmatprep.subr.mxu1 %v3886_v59  ;;  %v1642_v56 = vand.u32 4294901760, %v1641_v61  ;;  %v1691_v61 = vsub.f32 %v4230_v21, %v1690_v47 }
  0x91   : > { %3173 = vmatmul.mubr.f32.gmra.mxu0 %v1612_v31  ;;  %3206 = vmatmul.mubr.f32.gmra.mxu1 %v4118_v6  ;;  %v1662_v31 = vand.u32 4294901760, %v1661_v11 }
  0x92   : > { %3175 = vmatprep.mubr.f32.mxu0 %v1622_v1  ;;  %3208 = vmatprep.mubr.f32.mxu1 %v4137_v12  ;;  %v1672_v1 = vand.u32 4294901760, %v1671_v40 }
  0x93   : > { %3280 = vmatprep.subr.mxu0 %v3920_v49 }
  0x95   : > { %3176 = vmatmul.mubr.f32.gmra.mxu0 %v1632_v2  ;;  %3209 = vmatmul.mubr.f32.gmra.mxu1 %v4151_v60  ;;  %v1710_v2 = vand.u32 4294901760, %v4252_v26 }
  0x96   : > { %3178 = vmatprep.mubr.f32.mxu0 %v1642_v56  ;;  %3211 = vmatprep.mubr.f32.mxu1 %v4162_v62  ;;  %v1692_v56 = vand.u32 4294901760, %v1691_v61 }
  0x97   : > { %v1711_v11 = vsub.f32 %v4252_v26, %v1710_v2 }
  0x99   : > { %3179 = vmatmul.mubr.f32.gmra.mxu0 %v1652_v18  ;;  %3212 = vmatmul.mubr.f32.gmra.mxu1 %v4180_v55  ;;  %v1702_v18 = vand.u32 4294901760, %v1701_v20  ;;  %v1712_v40 = vand.u32 4294901760, %v1711_v11 }
  0x9a   : > { %3181 = vmatprep.mubr.f32.mxu0 %v1662_v31  ;;  %3214 = vmatprep.mubr.f32.mxu1 %v4189_v57 }
  0x9d   : > { %3182 = vmatmul.mubr.f32.gmra.mxu0 %v1672_v1  ;;  %3215 = vmatmul.mubr.f32.gmra.mxu1 %v4205_v52 }
  0x9e   : > { %3184 = vmatprep.mubr.f32.mxu0 %v1682_v44  ;;  %3217 = vmatprep.mubr.f32.mxu1 %v4217_v17 }
  0xa1   : > { %3185 = vmatmul.mubr.f32.gmra.mxu0 %v1692_v56  ;;  %3218 = vmatmul.mubr.f32.gmra.mxu1 %v4233_v10 }
  0xa2   : > { %3187 = vmatprep.mubr.f32.mxu0 %v1702_v18  ;;  %3256 = vmatprep.mubr.f32.mxu1 %v1560_v30 }
  0xa5   : > { %3188 = vmatmul.mubr.f32.gmra.mxu0 %v1712_v40  ;;  %3257 = vmatmul.mubr.f32.vlgmr.msra.gmra.mxu1 %v1570_v35 }
  0xa6   : > { %3226 = vmatprep.mubr.f32.mxu0 %v4066_v54  ;;  %3311 = vmatpush3.msra.mxu1 %v3886_v59 }
  0xa7   : > { %3259 = vmatprep.mubr.f32.mxu1 %v1580_v39  ;;  %3312 = vmatprep.subr.mxu1 %v3985_v5 }
  0xa8   : > { %3313 = vmatpush3.msra.mxu1 %v3985_v5 }
  0xa9   : > { %3227 = vmatmul.mubr.f32.vlgmr.msra.gmra.mxu0 %v4073_v58  ;;  %3260 = vmatmul.mubr.f32.gmra.mxu1 %v1590_v4 }
  0xaa   : > { %3281 = vmatpush3.msra.mxu0 %v3920_v49  ;;  %3229 = vmatprep.mubr.f32.mxu0 %v4085_v32 }
  0xab   : > { %3262 = vmatprep.mubr.f32.mxu1 %v1600_v42  ;;  %3282 = vmatprep.subr.mxu0 %v4008_v7 }
  0xac   : > { %3283 = vmatpush3.msra.mxu0 %v4008_v7  ;;  %3314 = vmatprep.subr.mxu1 %v3999_v29 }
  0xad   : > { %3230 = vmatmul.mubr.f32.gmra.mxu0 %v4098_v36  ;;  %3263 = vmatmul.mubr.f32.gmra.mxu1 %v1610_v45 }
  0xae   : > { %3232 = vmatprep.mubr.f32.mxu0 %v4111_v41  ;;  %3265 = vmatprep.mubr.f32.mxu1 %v1620_v51 }
  0xaf   : > { %3284 = vmatprep.subr.mxu0 %v4022_v9  ;;  %3315 = vmatpush3.msra.mxu1 %v3999_v29 }
  0xb0   : > { %3285 = vmatpush3.msra.mxu0 %v4022_v9 }
  0xb1   : > { %3233 = vmatmul.mubr.f32.gmra.mxu0 %v4115_v16  ;;  %3266 = vmatmul.mubr.f32.gmra.mxu1 %v1630_v24 }
  0xb2   : > { %3235 = vmatprep.mubr.f32.mxu0 %v4128_v13  ;;  %3268 = vmatprep.mubr.f32.mxu1 %v1640_v19 }
  0xb5   : > { %3236 = vmatmul.mubr.f32.gmra.mxu0 %v4142_v25  ;;  %3269 = vmatmul.mubr.f32.gmra.mxu1 %v1650_v33 }
  0xb6   : > { %3238 = vmatprep.mubr.f32.mxu0 %v4159_v53  ;;  %3271 = vmatprep.mubr.f32.mxu1 %v1660_v48 }
  0xb9   : > { %3239 = vmatmul.mubr.f32.gmra.mxu0 %v4177_v22  ;;  %3272 = vmatmul.mubr.f32.gmra.mxu1 %v1670_v8 }
  0xba   : > { %3241 = vmatprep.mubr.f32.mxu0 %v4186_v14  ;;  %3274 = vmatprep.mubr.f32.mxu1 %v1680_v38 }
  0xbd   : > { %3242 = vmatmul.mubr.f32.gmra.mxu0 %v4202_v37  ;;  %3275 = vmatmul.mubr.f32.gmra.mxu1 %v1690_v47 }
  0xbe   : > { %3244 = vmatprep.mubr.f32.mxu0 %v4214_v46  ;;  %3277 = vmatprep.mubr.f32.mxu1 %v1700_v28 }
  0xc1   : > { %3245 = vmatmul.mubr.f32.gmra.mxu0 %v4230_v21  ;;  %3278 = vmatmul.mubr.f32.gmra.mxu1 %v1710_v2 }
  0xc2   : > { %3247 = vmatprep.mubr.f32.mxu0 %v4242_v23  ;;  %3316 = vmatprep.mubr.f32.mxu1 %v4054_v34 }
  0xc5   : > { %3248 = vmatmul.mubr.f32.gmra.mxu0 %v4252_v26  ;;  %3317 = vmatmul.mubr.f32.vlgmr.msra.gmra.mxu1 %v4058_v43 }
  0xc6   : > { %3286 = vmatprep.mubr.f32.mxu0 %v4054_v34  ;;  %3319 = vmatprep.mubr.f32.mxu1 %v4069_v63 }
  0xc9   : > { %3287 = vmatmul.mubr.f32.vlgmr.msra.gmra.mxu0 %v4058_v43  ;;  %3320 = vmatmul.mubr.f32.gmra.mxu1 %v4078_v0 }
  0xca   : > { %3289 = vmatprep.mubr.f32.mxu0 %v4069_v63  ;;  %3322 = vmatprep.mubr.f32.mxu1 %v4088_v50 }
  0xcd   : > { %3290 = vmatmul.mubr.f32.gmra.mxu0 %v4078_v0  ;;  %3323 = vmatmul.mubr.f32.gmra.mxu1 %v4091_v3 }
  0xce   : > { %3292 = vmatprep.mubr.f32.mxu0 %v4088_v50  ;;  %3325 = vmatprep.mubr.f32.mxu1 %v4101_v15 }
  0xd1   : > { %3293 = vmatmul.mubr.f32.gmra.mxu0 %v4091_v3  ;;  %3326 = vmatmul.mubr.f32.gmra.mxu1 %v4118_v6 }
  0xd2   : > { %3295 = vmatprep.mubr.f32.mxu0 %v4101_v15  ;;  %3328 = vmatprep.mubr.f32.mxu1 %v4137_v12 }
  0xd5   : > { %3296 = vmatmul.mubr.f32.gmra.mxu0 %v4118_v6  ;;  %3329 = vmatmul.mubr.f32.gmra.mxu1 %v4151_v60 }
  0xd6   : > { %3298 = vmatprep.mubr.f32.mxu0 %v4137_v12  ;;  %3331 = vmatprep.mubr.f32.mxu1 %v4162_v62 }
  0xd9   : > { %3299 = vmatmul.mubr.f32.gmra.mxu0 %v4151_v60  ;;  %3332 = vmatmul.mubr.f32.gmra.mxu1 %v4180_v55 }
  0xda   : > { %3301 = vmatprep.mubr.f32.mxu0 %v4162_v62  ;;  %3334 = vmatprep.mubr.f32.mxu1 %v4189_v57 }
  0xdd   : > { %3302 = vmatmul.mubr.f32.gmra.mxu0 %v4180_v55  ;;  %3335 = vmatmul.mubr.f32.gmra.mxu1 %v4205_v52 }
  0xde   : > { %3304 = vmatprep.mubr.f32.mxu0 %v4189_v57  ;;  %3337 = vmatprep.mubr.f32.mxu1 %v4217_v17 }
  0xe1   : > { %3305 = vmatmul.mubr.f32.gmra.mxu0 %v4205_v52  ;;  %3338 = vmatmul.mubr.f32.gmra.mxu1 %v4233_v10 }
  0xe2   : > { %3307 = vmatprep.mubr.f32.mxu0 %v4217_v17 }
  0xe5   : > { %3308 = vmatmul.mubr.f32.gmra.mxu0 %v4233_v10  ;;  %v3018_v59 = vpop.f32.mrf.mxu1 }
  0xe7   : > { %v597_v49 = vpop.f32.mrf.mxu1 }
  0xe8   : > { %v2988_v5 = vpop.f32.mrf.mxu0 }
  0xe9   : > { %v3021_v29 = vpop.f32.mrf.mxu1  ;;  %v604_v7 = vadd.f32 %v3018_v59, %v2988_v5 }
  0xea   : > { %v361_v9 = vpop.f32.mrf.mxu0 }
  0xeb   : > { %v609_v34 = vpop.f32.mrf.mxu1  ;;  %v598_v43 = vadd.f32 %v597_v49, %v361_v9 }
  0xed   : > { %v2991_v54 = vpop.f32.mrf.mxu0  ;;  %v3024_v63 = vpop.f32.mrf.mxu1 }
  0xee   : > { %v616_v58 = vadd.f32 %v3021_v29, %v2991_v54 }
  0xef   : > { %v381_v0 = vpop.f32.mrf.mxu0  ;;  %v621_v30 = vpop.f32.mrf.mxu1 }
  0xf0   : > { %v610_v32 = vadd.f32 %v609_v34, %v381_v0 }
  0xf1   : > { %v2994_v50 = vpop.f32.mrf.mxu0  ;;  %v3027_v3 = vpop.f32.mrf.mxu1 }
  0xf2   : > { %v628_v35 = vadd.f32 %v3024_v63, %v2994_v50 }
  0xf3   : > { %v401_v36 = vpop.f32.mrf.mxu0  ;;  %v633_v15 = vpop.f32.mrf.mxu1 }
  0xf4   : > { %v622_v39 = vadd.f32 %v621_v30, %v401_v36 }
  0xf5   : > { %v2997_v41 = vpop.f32.mrf.mxu0  ;;  %v3030_v16 = vpop.f32.mrf.mxu1 }
  0xf6   : > { %v640_v6 = vadd.f32 %v3027_v3, %v2997_v41 }
  0xf7   : > { %v421_v4 = vpop.f32.mrf.mxu0  ;;  %v645_v13 = vpop.f32.mrf.mxu1 }
  0xf8   : > { %v634_v42 = vadd.f32 %v633_v15, %v421_v4 }
  0xf9   : > { %v3000_v12 = vpop.f32.mrf.mxu0  ;;  %v3033_v45 = vpop.f32.mrf.mxu1 }
  0xfa   : > { %v652_v25 = vadd.f32 %v3030_v16, %v3000_v12 }
  0xfb   : > { %v441_v51 = vpop.f32.mrf.mxu0  ;;  %v657_v60 = vpop.f32.mrf.mxu1 }
  0xfc   : > { %v646_v53 = vadd.f32 %v645_v13, %v441_v51 }
  0xfd   : > { %v3003_v62 = vpop.f32.mrf.mxu0  ;;  %v3036_v24 = vpop.f32.mrf.mxu1 }
  0xfe   : > { %v664_v22 = vadd.f32 %v3033_v45, %v3003_v62 }
  0xff   : > { %v461_v55 = vpop.f32.mrf.mxu0  ;;  %v669_v19 = vpop.f32.mrf.mxu1 }
 0x100   : > { %v658_v14 = vadd.f32 %v657_v60, %v461_v55 }
 0x101   : > { %v3006_v57 = vpop.f32.mrf.mxu0  ;;  %v3039_v33 = vpop.f32.mrf.mxu1 }
 0x102   : > { %v676_v37 = vadd.f32 %v3036_v24, %v3006_v57 }
 0x103   : > { %v481_v52 = vpop.f32.mrf.mxu0  ;;  %v681_v48 = vpop.f32.mrf.mxu1 }
 0x104   : > { %v670_v46 = vadd.f32 %v669_v19, %v481_v52 }
 0x105   : > { %v3009_v17 = vpop.f32.mrf.mxu0  ;;  %v3078_v8 = vpop.f32.mrf.mxu1 }
 0x106   : > { %v688_v21 = vadd.f32 %v3039_v33, %v3009_v17 }
 0x107   : > { %v501_v10 = vpop.f32.mrf.mxu0  ;;  %v946_v38 = vpop.f32.mrf.mxu1 }
 0x108   : > { %v4352_v23 = vadd.f32 %v681_v48, %v501_v10 }
 0x109   : > { %v3048_v47 = vpop.f32.mrf.mxu0  ;;  %v3081_v26 = vpop.f32.mrf.mxu1 }
 0x10a   : > { %v773_v31 = vadd.f32 %v3048_v47, %v604_v7 }
 0x10b   : > { %v765_v27 = vpop.f32.mrf.mxu0  ;;  %v962_v28 = vpop.f32.mrf.mxu1 }
 0x10c   : > { %v955_v1 = vadd.f32 %v3078_v8, %v773_v31  ;;  %v766_v61 = vadd.f32 %v765_v27, %v598_v43 }
 0x10d   : > { %v3051_v2 = vpop.f32.mrf.mxu0  ;;  %v3084_v44 = vpop.f32.mrf.mxu1 }
 0x10e   : > { %v947_v20 = vadd.f32 %v946_v38, %v766_v61  ;;  %v787_v56 = vadd.f32 %v3051_v2, %v616_v58 }
 0x10f   : > { %v779_v11 = vpop.f32.mrf.mxu0  ;;  %v978_v18 = vpop.f32.mrf.mxu1 }
 0x110   : > { %v971_v40 = vadd.f32 %v3081_v26, %v787_v56  ;;  %v780_v59 = vadd.f32 %v779_v11, %v610_v32 }
 0x111   : > { %v3054_v49 = vpop.f32.mrf.mxu0  ;;  %v3087_v5 = vpop.f32.mrf.mxu1 }
 0x112   : > { %v963_v29 = vadd.f32 %v962_v28, %v780_v59  ;;  %v801_v9 = vadd.f32 %v3054_v49, %v628_v35 }
 0x113   : > { %v793_v34 = vpop.f32.mrf.mxu0  ;;  %v994_v54 = vpop.f32.mrf.mxu1 }
 0x114   : > { %v987_v63 = vadd.f32 %v3084_v44, %v801_v9  ;;  %v794_v7 = vadd.f32 %v793_v34, %v622_v39 }
 0x115   : > { %v3057_v0 = vpop.f32.mrf.mxu0  ;;  %v3090_v30 = vpop.f32.mrf.mxu1 }
 0x116   : > { %v979_v50 = vadd.f32 %v978_v18, %v794_v7  ;;  %v815_v43 = vadd.f32 %v3057_v0, %v640_v6 }
 0x117   : > { %v807_v3 = vpop.f32.mrf.mxu0  ;;  %v1010_v36 = vpop.f32.mrf.mxu1 }
 0x118   : > { %v1003_v15 = vadd.f32 %v3087_v5, %v815_v43  ;;  %v808_v58 = vadd.f32 %v807_v3, %v634_v42 }
 0x119   : > { %v3060_v41 = vpop.f32.mrf.mxu0  ;;  %v3093_v16 = vpop.f32.mrf.mxu1 }
 0x11a   : > { %v995_v4 = vadd.f32 %v994_v54, %v808_v58  ;;  %v829_v32 = vadd.f32 %v3060_v41, %v652_v25 }
 0x11b   : > { %v821_v13 = vpop.f32.mrf.mxu0  ;;  %v1026_v12 = vpop.f32.mrf.mxu1 }
 0x11c   : > { %v1019_v45 = vadd.f32 %v3090_v30, %v829_v32  ;;  %v822_v35 = vadd.f32 %v821_v13, %v646_v53 }
 0x11d   : > { %v3063_v51 = vpop.f32.mrf.mxu0  ;;  %v3096_v60 = vpop.f32.mrf.mxu1 }
 0x11e   : > { %v1011_v62 = vadd.f32 %v1010_v36, %v822_v35  ;;  %v843_v39 = vadd.f32 %v3063_v51, %v664_v22 }
 0x11f   : > { %v835_v24 = vpop.f32.mrf.mxu0  ;;  %v1042_v55 = vpop.f32.mrf.mxu1 }
 0x120   : > { %v1035_v19 = vadd.f32 %v3093_v16, %v843_v39  ;;  %v836_v6 = vadd.f32 %v835_v24, %v658_v14 }
 0x121   : > { %v3066_v57 = vpop.f32.mrf.mxu0  ;;  %v3099_v33 = vpop.f32.mrf.mxu1 }
 0x122   : > { %v1027_v52 = vadd.f32 %v1026_v12, %v836_v6  ;;  %v857_v42 = vadd.f32 %v3066_v57, %v676_v37 }
 0x123   : > { %v849_v48 = vpop.f32.mrf.mxu0  ;;  %v1058_v17 = vpop.f32.mrf.mxu1 }
 0x124   : > { %v1051_v8 = vadd.f32 %v3096_v60, %v857_v42  ;;  %v850_v25 = vadd.f32 %v849_v48, %v670_v46 }
 0x125   : > { %v3069_v10 = vpop.f32.mrf.mxu0  ;;  %v3138_v38 = vpop.f32.mrf.mxu1 }
 0x126   : > { %v1043_v47 = vadd.f32 %v1042_v55, %v850_v25  ;;  %v871_v53 = vadd.f32 %v3069_v10, %v688_v21 }
 0x127   : > { %v863_v26 = vpop.f32.mrf.mxu0  ;;  %v1310_v31 = vpop.f32.mrf.mxu1 }
 0x128   : > { %v1067_v27 = vadd.f32 %v3099_v33, %v871_v53  ;;  %v864_v22 = vadd.f32 %v863_v26, %v4352_v23 }
 0x129   : > { %v3108_v28 = vpop.f32.mrf.mxu0  ;;  %v3141_v61 = vpop.f32.mrf.mxu1 }
 0x12a   : > { %v1059_v14 = vadd.f32 %v1058_v17, %v864_v22  ;;  %v1153_v2 = vadd.f32 %v3108_v28, %v955_v1 }
 0x12b   : > { %v1146_v44 = vpop.f32.mrf.mxu0  ;;  %v1322_v56 = vpop.f32.mrf.mxu1 }
 0x12c   : > { %v4355_v37 = vadd.f32 %v3138_v38, %v1153_v2  ;;  %v1147_v11 = vadd.f32 %v1146_v44, %v947_v20 }
 0x12d   : > { %v3111_v18 = vpop.f32.mrf.mxu0  ;;  %v3144_v46 = vpop.f32.mrf.mxu1 }
 0x12e   : > { %v4357_v59 = vadd.f32 %v1310_v31, %v1147_v11  ;;  %v1165_v49 = vadd.f32 %v3111_v18, %v971_v40 }
 0x12f   : > { %v1158_v21 = vpop.f32.mrf.mxu0  ;;  %v1334_v5 = vpop.f32.mrf.mxu1 }
 0x130   : > { %v4359_v9 = vadd.f32 %v3141_v61, %v1165_v49  ;;  %v1159_v34 = vadd.f32 %v1158_v21, %v963_v29 }
 0x131   : > { %v3114_v23 = vpop.f32.mrf.mxu0  ;;  %v3147_v54 = vpop.f32.mrf.mxu1 }
 0x132   : > { %v4361_v7 = vadd.f32 %v1322_v56, %v1159_v34  ;;  %v1177_v1 = vadd.f32 %v3114_v23, %v987_v63 }
 0x133   : > { %v1170_v0 = vpop.f32.mrf.mxu0  ;;  %v1346_v30 = vpop.f32.mrf.mxu1 }
 0x134   : > { %v4363_v43 = vadd.f32 %v3144_v46, %v1177_v1  ;;  %v1171_v20 = vadd.f32 %v1170_v0, %v979_v50 }
 0x135   : > { %v3117_v3 = vpop.f32.mrf.mxu0  ;;  %v3150_v36 = vpop.f32.mrf.mxu1 }
 0x136   : > { %v4365_v58 = vadd.f32 %v1334_v5, %v1171_v20  ;;  %v1189_v40 = vadd.f32 %v3117_v3, %v1003_v15 }
 0x137   : > { %v1182_v41 = vpop.f32.mrf.mxu0  ;;  %v1358_v16 = vpop.f32.mrf.mxu1 }
 0x138   : > { %v4367_v32 = vadd.f32 %v3147_v54, %v1189_v40  ;;  %v1183_v29 = vadd.f32 %v1182_v41, %v995_v4 }
 0x139   : > { %v3120_v13 = vpop.f32.mrf.mxu0  ;;  %v3153_v12 = vpop.f32.mrf.mxu1 }
 0x13a   : > { %v4369_v35 = vadd.f32 %v1346_v30, %v1183_v29  ;;  %v1201_v63 = vadd.f32 %v3120_v13, %v1019_v45 }
 0x13b   : > { %v1194_v51 = vpop.f32.mrf.mxu0  ;;  %v1370_v60 = vpop.f32.mrf.mxu1 }
 0x13c   : > { %v4371_v39 = vadd.f32 %v3150_v36, %v1201_v63  ;;  %v1195_v50 = vadd.f32 %v1194_v51, %v1011_v62 }
 0x13d   : > { %v3123_v24 = vpop.f32.mrf.mxu0  ;;  %v3156_v55 = vpop.f32.mrf.mxu1 }
 0x13e   : > { %v4373_v6 = vadd.f32 %v1358_v16, %v1195_v50  ;;  %v1213_v15 = vadd.f32 %v3123_v24, %v1035_v19 }
 0x13f   : > { %v1206_v57 = vpop.f32.mrf.mxu0  ;;  %v1382_v33 = vpop.f32.mrf.mxu1 }
 0x140   : > { %v4375_v42 = vadd.f32 %v3153_v12, %v1213_v15  ;;  %v1207_v4 = vadd.f32 %v1206_v57, %v1027_v52 }
 0x141   : > { %v3126_v48 = vpop.f32.mrf.mxu0  ;;  %v3159_v17 = vpop.f32.mrf.mxu1 }
 0x142   : > { %v4377_v25 = vadd.f32 %v1370_v60, %v1207_v4  ;;  %v1225_v45 = vadd.f32 %v3126_v48, %v1051_v8 }
 0x143   : > { %v1218_v10 = vpop.f32.mrf.mxu0  ;;  %v1394_v38 = vpop.f32.mrf.mxu1 }
 0x144   : > { %v4379_v53 = vadd.f32 %v3156_v55, %v1225_v45  ;;  %v1219_v62 = vadd.f32 %v1218_v10, %v1043_v47 }
 0x145   : > { %v3129_v26 = vpop.f32.mrf.mxu0  ;;  %v4381_v31 = vpop.f32.mrf.mxu1 }
 0x146   : > { %v4383_v22 = vadd.f32 %v1382_v33, %v1219_v62  ;;  %v1237_v19 = vadd.f32 %v3129_v26, %v1067_v27 }
 0x147   : > { %v1230_v28 = vpop.f32.mrf.mxu0  ;;  %v4385_v61 = vpop.f32.mrf.mxu1 }
 0x148   : > { %v4387_v52 = vadd.f32 %v3159_v17, %v1237_v19  ;;  %v1231_v2 = vadd.f32 %v1230_v28, %v1059_v14 }
 0x149   : > { %v4389_v44 = vpop.f32.mrf.mxu0  ;;  %v4391_v8 = vpop.f32.mrf.mxu1 }
 0x14a   : > { %4721 = vst [vmem:[#allocation6_spill] sm:$0xff] %v4387_v52  ;;  %v4393_v56 = vadd.f32 %v1394_v38, %v1231_v2  ;;  %v1409_v52 = vmax.f32 %v4363_v43, 1e-24 }
 0x14b   : > { %v4395_v11 = vpop.f32.mrf.mxu0  ;;  %v4397_v47 = vpop.f32.mrf.mxu1 }
 0x14c   : > { %4722 = vst [vmem:[#allocation5_spill] sm:$0xff] %v4393_v56 }
 0x14d   : > { %v4399_v18 = vpop.f32.mrf.mxu0  ;;  %v4401_v46 = vpop.f32.mrf.mxu1 }
 0x14f   : > { %v4403_v27 = vpop.f32.mrf.mxu0  ;;  %v4405_v49 = vpop.f32.mrf.mxu1 }
 0x151   : > { %v4407_v21 = vpop.f32.mrf.mxu0  ;;  %v4409_v14 = vpop.f32.mrf.mxu1 }
 0x153   : > { %v4411_v5 = vpop.f32.mrf.mxu0  ;;  %v4413_v34 = vpop.f32.mrf.mxu1 }
 0x155   : > { %v4415_v23 = vpop.f32.mrf.mxu0  ;;  %v4417_v54 = vpop.f32.mrf.mxu1 }
 0x157   : > { %v4419_v1 = vpop.f32.mrf.mxu0  ;;  %v4421_v0 = vpop.f32.mrf.mxu1 }
 0x159   : > { %v4423_v30 = vpop.f32.mrf.mxu0  ;;  %v4425_v20 = vpop.f32.mrf.mxu1 }
 0x15b   : > { %v4427_v3 = vpop.f32.mrf.mxu0  ;;  %v4429_v36 = vpop.f32.mrf.mxu1 }
 0x15c   : > { %4723 = vst [vmem:[#allocation7_spill] sm:$0xff] %v4429_v36  ;;  %v1407_v36 = vmax.f32 %v4359_v9, 1e-24  ;;  %v1411_v9 = vmax.f32 %v4367_v32, 1e-24  ;;  %v1819_v32 = vadd.f32 %v4391_v8, %v4399_v18  ;;  %v1831_v8 = vadd.f32 %v4401_v46, %v4407_v21 }
 0x15d   : > { %v4431_v40 = vpop.f32.mrf.mxu0  ;;  %v4433_v41 = vpop.f32.mrf.mxu1 }
 0x15e   : > { %4724 = vst [vmem:[#allocation8_spill] sm:$0xff] %v4433_v41  ;;  %v1405_v41 = vmax.f32 %v4355_v37, 1e-24 }
 0x15f   : > { %v4435_v16 = vpop.f32.mrf.mxu0  ;;  %v4437_v29 = vpop.f32.mrf.mxu1 }
 0x160   : > { %4725 = vst [vmem:[#allocation9_spill] sm:$0xff] %v4435_v16  ;;  %4726 = vst [vmem:[#allocation10_spill] sm:$0xff] %v4437_v29  ;;  %3381 = vrsqrt.f32 %v1405_v41 }
 0x161   : > { %v4439_v13 = vpop.f32.mrf.mxu0  ;;  %v4441_v12 = vpop.f32.mrf.mxu1 }
 0x162   : > { %4727 = vst [vmem:[#allocation11_spill] sm:$0xff] %v4439_v13  ;;  %4728 = vst [vmem:[#allocation12_spill] sm:$0xff] %v4441_v12 }
 0x163   : > { %v4443_v63 = vpop.f32.mrf.mxu0  ;;  %v4445_v51 = vpop.f32.mrf.mxu1 }
 0x164   : > { %4729 = vst [vmem:[#allocation13_spill] sm:$0xff] %v4443_v63  ;;  %4730 = vst [vmem:[#allocation14_spill] sm:$0xff] %v4445_v51 }
 0x165   : > { %v4447_v60 = vpop.f32.mrf.mxu0  ;;  %v3258_v50 = vpop.f32.mrf.mxu1 }
 0x166   : > { %4731 = vst [vmem:[#allocation15_spill] sm:$0xff] %v4447_v60 }
 0x167   : > { %v4449_v24 = vpop.f32.mrf.mxu0  ;;  %v4451_v55 = vpop.f32.mrf.mxu1 }
 0x168   : > { %4732 = vst [vmem:[#allocation16_spill] sm:$0xff] %v4449_v24 }
 0x169   : > { %v3228_v15 = vpop.f32.mrf.mxu0  ;;  %v4453_v57 = vpop.f32.mrf.mxu1 }
 0x16b   : > { %v1968_v33 = vpop.f32.mrf.mxu0  ;;  %v4455_v4 = vpop.f32.mrf.mxu1 }
 0x16d   : > { %v3231_v48 = vpop.f32.mrf.mxu0  ;;  %v4457_v17 = vpop.f32.mrf.mxu1 }
 0x16f   : > { %v1982_v45 = vpop.f32.mrf.mxu0  ;;  %v4459_v10 = vpop.f32.mrf.mxu1 }
 0x171   : > { %v3234_v38 = vpop.f32.mrf.mxu0  ;;  %v4461_v62 = vpop.f32.mrf.mxu1 }
 0x173   : > { %v4463_v26 = vpop.f32.mrf.mxu0  ;;  %v4465_v19 = vpop.f32.mrf.mxu1 }
 0x175   : > { %v4467_v28 = vpop.f32.mrf.mxu0  ;;  %v4469_v2 = vpop.f32.mrf.mxu1 }
 0x176   : > { %4733 = vst [vmem:[#allocation17_spill] sm:$0xff] %v4469_v2  ;;  %v1404_v2 = vmax.f32 %v4357_v59, 1e-24  ;;  %v1807_v59 = vadd.f32 %v4381_v31, %v4389_v44  ;;  %v1413_v31 = vmax.f32 %v4371_v39, 1e-24 }
 0x177   : > { %v4471_v51 = vpop.f32.mrf.mxu0  ;;  %v4473_v24 = vpop.f32.mrf.mxu1  ;;  %v1414_v39 = vmax.f32 %v4377_v25, 1e-24 }
 0x178   : > { %4734 = vst [vmem:[#allocation18_spill] sm:$0xff] %v4473_v24  ;;  %3383 = vrsqrt.f32 %v1404_v2  ;;  %v1976_v43 = vadd.f32 %v3228_v15, %v1807_v59  ;;  %v1410_v2 = vmax.f32 %v4369_v35, 1e-24  ;;  %v1813_v35 = vadd.f32 %v4397_v47, %v4403_v27  ;;  %v3382_v59 = vpop.eup %3381 }
 0x179   : > { %v4475_v12 = vpop.f32.mrf.mxu0  ;;  %v4477_v60 = vpop.f32.mrf.mxu1  ;;  %3385 = vrsqrt.f32 %v1407_v36  ;;  %v1412_v36 = vmax.f32 %v4373_v6, 1e-24  ;;  %v1825_v47 = vadd.f32 %v4405_v49, %v4411_v5  ;;  %v2004_v27 = vadd.f32 %v3234_v38, %v1831_v8  ;;  %v4540_v49 = vld [vmem:[%s4676_s3] ss:$0 sm:$0xff] }
 0x17a   : > { %4735 = vst [vmem:[#allocation19_spill] sm:$0xff] %v4477_v60  ;;  %v1406_v60 = vmax.f32 %v4361_v7, 1e-24  ;;  %v1801_v7 = vadd.f32 %v4385_v61, %v4395_v11  ;;  %v2158_v11 = vadd.f32 %v3258_v50, %v1976_v43 }
 0x17b   : > { %v4479_v29 = vpop.f32.mrf.mxu0  ;;  %v4481_v63 = vpop.f32.mrf.mxu1 }
 0x17c   : > { %4736 = vst [vmem:[#allocation20_spill] sm:$0xff] %v4481_v63  ;;  %3387 = vrsqrt.f32 %v1406_v60  ;;  %v1969_v44 = vadd.f32 %v1968_v33, %v1801_v7  ;;  %v1983_v33 = vadd.f32 %v1982_v45, %v1813_v35  ;;  %v1997_v45 = vadd.f32 %v4463_v26, %v1825_v47 }
 0x17d   : > { %v4484_v13 = vpop.f32.mrf.mxu0  ;;  %v4486_v56 = vpop.f32.mrf.mxu1  ;;  %3389 = vrsqrt.f32 %v1409_v52  ;;  %v1415_v52 = vmax.f32 %v4375_v42, 1e-24 }
 0x17e   : > { %4737 = vst [vmem:[#allocation21_spill] sm:$0xff] %v4486_v56  ;;  %v1408_v56 = vmax.f32 %v4365_v58, 1e-24  ;;  %v2150_v15 = vadd.f32 %v4451_v55, %v1969_v44  ;;  %v1843_v55 = vadd.f32 %v4409_v14, %v4415_v23  ;;  %v1837_v14 = vadd.f32 %v4413_v34, %v4419_v1 }
 0x17f   : > { %v4490_v16 = vpop.f32.mrf.mxu0  ;;  %v4492_v24 = vpop.f32.mrf.mxu1  ;;  %v2190_v23 = vadd.f32 %v4457_v17, %v2004_v27  ;;  %v2182_v34 = vadd.f32 %v4459_v10, %v1997_v45 }
 0x180   : > { %4738 = vst [vmem:[#allocation22_spill] sm:$0xff] %v4490_v16  ;;  %3391 = vrsqrt.f32 %v1408_v56  ;;  %v1990_v56 = vadd.f32 %v3231_v48, %v1819_v32  ;;  %v2018_v26 = vadd.f32 %v4467_v28, %v1843_v55  ;;  %v2011_v1 = vadd.f32 %v4471_v51, %v1837_v14 }
 0x181   : > { %v4496_v63 = vpop.f32.mrf.mxu0  ;;  %v4498_v37 = vpop.f32.mrf.mxu1  ;;  %3393 = vrsqrt.f32 %v1411_v9 }
 0x182   : > { %4739 = vst [vmem:[#allocation23_spill] sm:$0xff] %v4498_v37  ;;  %3395 = vrsqrt.f32 %v1410_v2  ;;  %v2174_v25 = vadd.f32 %v4453_v57, %v1990_v56  ;;  %v2166_v57 = vadd.f32 %v4455_v4, %v1983_v33 }
 0x183   : > { %v4504_v16 = vpop.f32.mrf.mxu0  ;;  %v4506_v41 = vpop.f32.mrf.mxu1  ;;  %3397 = vrsqrt.f32 %v1413_v31 }
 0x184   : > { %3399 = vrsqrt.f32 %v1412_v36 }
 0x185   : > { %v4511_v37 = vpop.f32.mrf.mxu0  ;;  %v3318_v58 = vpop.f32.mrf.mxu1  ;;  %3401 = vrsqrt.f32 %v1415_v52 }
 0x186   : > { %3403 = vrsqrt.f32 %v1414_v39  ;;  %v3384_v2 = vpop.eup %3383 }
 0x187   : > { %v4517_v60 = vpop.f32.mrf.mxu0  ;;  %v2513_v61 = vpop.f32.mrf.mxu1 }
 0x188   : > { %v3386_v44 = vpop.eup %3385 }
 0x189   : > { %v3288_v18 = vpop.f32.mrf.mxu0  ;;  %v3321_v6 = vpop.f32.mrf.mxu1 }
 0x18a   : > { %v2356_v42 = vadd.f32 %v3288_v18, %v2158_v11  ;;  %v3388_v35 = vpop.eup %3387  ;;  %v1416_v11 = vmax.f32 %v4383_v22, 1e-24 }
 0x18b   : > { %v2349_v50 = vpop.f32.mrf.mxu0  ;;  %v2525_v48 = vpop.f32.mrf.mxu1 }
 0x18c   : > { %v2520_v46 = vadd.f32 %v3318_v58, %v2356_v42  ;;  %v2350_v21 = vadd.f32 %v2349_v50, %v2150_v15  ;;  %v1417_v58 = vmax.f32 %v4379_v53, 1e-24  ;;  %v1855_v53 = vadd.f32 %v4417_v54, %v4423_v30  ;;  %v3390_v56 = vpop.eup %3389 }
 0x18d   : > { %v3291_v5 = vpop.f32.mrf.mxu0  ;;  %v3324_v38 = vpop.f32.mrf.mxu1  ;;  %v1849_v54 = vadd.f32 %v4421_v0, %v4427_v3  ;;  %v2206_v30 = vadd.f32 %v4461_v62, %v2018_v26  ;;  %v2198_v0 = vadd.f32 %v4465_v19, %v2011_v1 }
 0x18e   : > { %v2608_v9 = vmul.f32 %v3382_v59, %v2520_v46  ;;  %v2514_v7 = vadd.f32 %v2513_v61, %v2350_v21  ;;  %v2368_v43 = vadd.f32 %v3291_v5, %v2174_v25  ;;  %3405 = vrsqrt.f32 %v1417_v58  ;;  %v4740_v5 = vld [vmem:[#allocation6_spill] sm:$0xff] }
 0x18f   : > { %v2361_v31 = vpop.f32.mrf.mxu0  ;;  %v2537_v32 = vpop.f32.mrf.mxu1  ;;  %v2032_v51 = vadd.f32 %v4475_v12, %v1855_v53  ;;  %3407 = vrsqrt.f32 %v1416_v11  ;;  %v2025_v3 = vadd.f32 %v4479_v29, %v1849_v54  ;;  %v4748_v11 = vld [vmem:[#allocation22_spill] sm:$0xff] }
 0x190   : > { %v2631_v36 = vadd.f32 %v4540_v49, %v2608_v9  ;;  %v2607_v4 = vmul.f32 %v3384_v2, %v2514_v7  ;;  %v2532_v52 = vadd.f32 %v3321_v6, %v2368_v43  ;;  %v2362_v61 = vadd.f32 %v2361_v31, %v2166_v57  ;;  %v3392_v6 = vpop.eup %3391  ;;  %v4741_v57 = vld [vmem:[#allocation9_spill] sm:$0xff]  ;;  %v4742_v9 = vld [vmem:[#allocation7_spill] sm:$0xff] }
 0x191   : > { %v3294_v17 = vpop.f32.mrf.mxu0  ;;  %v3327_v28 = vpop.f32.mrf.mxu1 }
 0x192   : > { %2647 = vst [vmem:[%s4555_s5 + $0x8] sm:$0xff] %v2631_v36  ;;  %v2630_v39 = vadd.f32 %v4540_v49, %v2607_v4  ;;  %v2610_v8 = vmul.f32 %v3386_v44, %v2532_v52  ;;  %v2526_v18 = vadd.f32 %v2525_v48, %v2362_v61  ;;  %v2380_v22 = vadd.f32 %v3294_v17, %v2190_v23  ;;  %v3394_v33 = vpop.eup %3393  ;;  %v4745_v36 = vld [vmem:[#allocation11_spill] sm:$0xff]  ;;  %v4746_v4 = vld [vmem:[#allocation8_spill] sm:$0xff]  ;;  %v4747_v61 = vld [vmem:[#allocation18_spill] sm:$0xff] }
 0x193   : > { %v2373_v10 = vpop.f32.mrf.mxu0  ;;  %v2549_v15 = vpop.f32.mrf.mxu1  ;;  %v1867_v48 = vadd.f32 %v4425_v20, %v4431_v40  ;;  %v1861_v20 = vadd.f32 %v4742_v9, %v4741_v57  ;;  %v4743_v40 = vld [vmem:[#allocation17_spill] sm:$0xff]  ;;  %v1879_v52 = vadd.f32 %v4746_v4, %v4745_v36  ;;  %v4758_v4 = vld [vmem:[#allocation23_spill] sm:$0xff] }
 0x194   : > { %2646 = vst [vmem:[%s4555_s5] sm:$0xff] %v2630_v39  ;;  %v2633_v42 = vadd.f32 %v4540_v49, %v2610_v8  ;;  %v2609_v47 = vmul.f32 %v3388_v35, %v2526_v18  ;;  %v2544_v27 = vadd.f32 %v3324_v38, %v2380_v22  ;;  %v2374_v50 = vadd.f32 %v2373_v10, %v2182_v34  ;;  %v3396_v25 = vpop.eup %3395  ;;  %v4749_v8 = vld [vmem:[#allocation13_spill] sm:$0xff]  ;;  %v4750_v18 = vld [vmem:[#allocation10_spill] sm:$0xff] }
 0x195   : > { %v3297_v62 = vpop.f32.mrf.mxu0  ;;  %v3330_v12 = vpop.f32.mrf.mxu1  ;;  %v1419_v38 = vmax.f32 %v4740_v5, 1e-24  ;;  %v2222_v19 = vadd.f32 %v4743_v40, %v2032_v51  ;;  %v2046_v29 = vadd.f32 %v4484_v13, %v1867_v48  ;;  %v2214_v35 = vadd.f32 %v4747_v61, %v2025_v3  ;;  %v4757_v57 = vld [vmem:[#allocation21_spill] sm:$0xff] }
 0x196   : > { %2649 = vst [vmem:[%s4555_s5 + $0x18] sm:$0xff] %v2633_v42  ;;  %v2632_v46 = vadd.f32 %v4540_v49, %v2609_v47  ;;  %v2612_v21 = vmul.f32 %v3390_v56, %v2544_v27  ;;  %v2538_v59 = vadd.f32 %v2537_v32, %v2374_v50  ;;  %v2392_v55 = vadd.f32 %v3297_v62, %v2206_v30  ;;  %v3398_v45 = vpop.eup %3397  ;;  %v4744_v32 = vld [vmem:[#allocation5_spill] sm:$0xff] }
 0x197   : > { %v2385_v7 = vpop.f32.mrf.mxu0  ;;  %v2561_v43 = vpop.f32.mrf.mxu1  ;;  %v1418_v44 = vmax.f32 %v4744_v32, 1e-24  ;;  %v2039_v13 = vadd.f32 %v4748_v11, %v1861_v20  ;;  %3409 = vrsqrt.f32 %v1419_v38  ;;  %v1873_v22 = vadd.f32 %v4750_v18, %v4749_v8 }
 0x198   : > { %v3400_v2 = vpop.eup %3399  ;;  %2648 = vst [vmem:[%s4555_s5 + $0x10] sm:$0xff] %v2632_v46  ;;  %v2635_v58 = vadd.f32 %v4540_v49, %v2612_v21  ;;  %v2611_v14 = vmul.f32 %v3392_v6, %v2538_v59  ;;  %v2556_v23 = vadd.f32 %v3327_v28, %v2392_v55  ;;  %v2386_v26 = vadd.f32 %v2385_v7, %v2198_v0  ;;  %v4751_v6 = vld [vmem:[#allocation19_spill] sm:$0xff]  ;;  %v4754_v0 = vld [vmem:[#allocation20_spill] sm:$0xff] }
 0x199   : > { %v3402_v31 = vpop.eup %3401  ;;  %v3300_v53 = vpop.f32.mrf.mxu0  ;;  %v2238_v54 = vadd.f32 %v4751_v6, %v2046_v29  ;;  %v2060_v30 = vadd.f32 %v4496_v63, %v1879_v52  ;;  %3411 = vrsqrt.f32 %v1418_v44  ;;  %v2230_v3 = vadd.f32 %v4754_v0, %v2039_v13 }
 0x19a   : > { %v3333_v34 = vpop.f32.mrf.mxu1  ;;  %v3404_v1 = vpop.eup %3403  ;;  %2651 = vst [vmem:[%s4555_s5 + $0x28] sm:$0xff] %v2635_v58  ;;  %v2634_v17 = vadd.f32 %v4540_v49, %v2611_v14  ;;  %v2614_v56 = vmul.f32 %v3394_v33, %v2556_v23  ;;  %v2550_v28 = vadd.f32 %v2549_v15, %v2386_v26  ;;  %v2404_v39 = vadd.f32 %v3300_v53, %v2222_v19  ;;  %v4752_v15 = vld [vmem:[#allocation15_spill] sm:$0xff]  ;;  %v4753_v33 = vld [vmem:[#allocation12_spill] sm:$0xff] }
 0x19b   : > { %v2397_v51 = vpop.f32.mrf.mxu0  ;;  %v1891_v48 = vadd.f32 %v4753_v33, %v4752_v15  ;;  %v2053_v62 = vadd.f32 %v4504_v16, %v1873_v22  ;;  %v2254_v9 = vadd.f32 %v4757_v57, %v2060_v30  ;;  %v3406_v19 = vpop.eup %3405 }
 0x19c   : > { %v2573_v10 = vpop.f32.mrf.mxu1  ;;  %2650 = vst [vmem:[%s4555_s5 + $0x20] sm:$0xff] %v2634_v17  ;;  %v2637_v42 = vadd.f32 %v4540_v49, %v2614_v56  ;;  %v2613_v47 = vmul.f32 %v3396_v25, %v2550_v28  ;;  %v2568_v27 = vadd.f32 %v3330_v12, %v2404_v39  ;;  %v2398_v50 = vadd.f32 %v2397_v51, %v2214_v35  ;;  %v4755_v25 = vld [vmem:[#allocation16_spill] sm:$0xff]  ;;  %v4756_v12 = vld [vmem:[#allocation14_spill] sm:$0xff]  ;;  %v3408_v26 = vpop.eup %3407 }
 0x19d   : > { %v3303_v46 = vpop.f32.mrf.mxu0  ;;  %v1885_v38 = vadd.f32 %v4756_v12, %v4755_v25  ;;  %v2074_v20 = vadd.f32 %v4511_v37, %v1891_v48 }
 0x19e   : > { %v3336_v21 = vpop.f32.mrf.mxu1  ;;  %2653 = vst [vmem:[%s4555_s5 + $0x38] sm:$0xff] %v2637_v42  ;;  %v2636_v63 = vadd.f32 %v4540_v49, %v2613_v47  ;;  %v2616_v59 = vmul.f32 %v3398_v45, %v2568_v27  ;;  %v2562_v55 = vadd.f32 %v2561_v43, %v2398_v50  ;;  %v2416_v5 = vadd.f32 %v3303_v46, %v2238_v54 }
 0x19f   : > { %v2409_v40 = vpop.f32.mrf.mxu0  ;;  %v2246_v45 = vadd.f32 %v4492_v24, %v2053_v62  ;;  %v2067_v43 = vadd.f32 %v4517_v60, %v1885_v38  ;;  %v2270_v52 = vadd.f32 %v4758_v4, %v2074_v20 }
 0x1a0   : > { %2652 = vst [vmem:[%s4555_s5 + $0x30] sm:$0xff] %v2636_v63  ;;  %v2639_v16 = vadd.f32 %v4540_v49, %v2616_v59  ;;  %v2615_v29 = vmul.f32 %v3400_v2, %v2562_v55  ;;  %v2580_v7 = vadd.f32 %v3333_v34, %v2416_v5  ;;  %v2410_v58 = vadd.f32 %v2409_v40, %v2230_v3  ;;  %v2585_v23 = vpop.f32.mrf.mxu1 }
 0x1a1   : > { %v3306_v14 = vpop.f32.mrf.mxu0  ;;  %v2262_v11 = vadd.f32 %v4506_v41, %v2067_v43 }
 0x1a2   : > { %2655 = vst [vmem:[%s4555_s5 + $0x48] sm:$0xff] %v2639_v16  ;;  %v2638_v37 = vadd.f32 %v4540_v49, %v2615_v29  ;;  %v2618_v32 = vmul.f32 %v3402_v31, %v2580_v7  ;;  %v2574_v44 = vadd.f32 %v2573_v10, %v2410_v58  ;;  %v2428_v36 = vadd.f32 %v3306_v14, %v2254_v9  ;;  %v3339_v53 = vpop.f32.mrf.mxu1 }
 0x1a3   : > { %v2421_v61 = vpop.f32.mrf.mxu0 }
 0x1a4   : > { %2654 = vst [vmem:[%s4555_s5 + $0x40] sm:$0xff] %v2638_v37  ;;  %v2641_v2 = vadd.f32 %v4540_v49, %v2618_v32  ;;  %v2617_v24 = vmul.f32 %v3404_v1, %v2574_v44  ;;  %v2592_v35 = vadd.f32 %v3336_v21, %v2428_v36  ;;  %v2422_v60 = vadd.f32 %v2421_v61, %v2246_v45  ;;  %v3410_v39 = vpop.eup %3409  ;;  %v2597_v22 = vpop.f32.mrf.mxu1 }
 0x1a5   : > { %v3309_v13 = vpop.f32.mrf.mxu0 }
 0x1a6   : > { %2657 = vst [vmem:[%s4555_s5 + $0x58] sm:$0xff] %v2641_v2  ;;  %v2640_v31 = vadd.f32 %v4540_v49, %v2617_v24  ;;  %v2620_v34 = vmul.f32 %v3406_v19, %v2592_v35  ;;  %v2586_v17 = vadd.f32 %v2585_v23, %v2422_v60  ;;  %v2440_v56 = vadd.f32 %v3309_v13, %v2270_v52  ;;  %v3412_v6 = vpop.eup %3411 }
 0x1a7   : > { %v2433_v28 = vpop.f32.mrf.mxu0 }
 0x1a8   : > { %2656 = vst [vmem:[%s4555_s5 + $0x50] sm:$0xff] %v2640_v31  ;;  %v2643_v1 = vadd.f32 %v4540_v49, %v2620_v34  ;;  %v2619_v8 = vmul.f32 %v3408_v26, %v2586_v17  ;;  %v2604_v41 = vadd.f32 %v3339_v53, %v2440_v56  ;;  %v2434_v18 = vadd.f32 %v2433_v28, %v2262_v11 }
 0x1aa   : > { %2659 = vst [vmem:[%s4555_s5 + $0x68] sm:$0xff] %v2643_v1  ;;  %v2642_v54 = vadd.f32 %v4540_v49, %v2619_v8  ;;  %v2622_v30 = vmul.f32 %v3410_v39, %v2604_v41  ;;  %v2598_v51 = vadd.f32 %v2597_v22, %v2434_v18 }
 0x1ac   : > { %2658 = vst [vmem:[%s4555_s5 + $0x60] sm:$0xff] %v2642_v54  ;;  %v2645_v10 = vadd.f32 %v4540_v49, %v2622_v30  ;;  %v2621_v42 = vmul.f32 %v3412_v6, %v2598_v51 }
 0x1ae   : > { %2661 = vst [vmem:[%s4555_s5 + $0x78] sm:$0xff] %v2645_v10  ;;  %v2644_v47 = vadd.f32 %v4540_v49, %v2621_v42 }
 0x1b0   : > { %2660 = vst [vmem:[%s4555_s5 + $0x70] sm:$0xff] %v2644_v47 }
 0x1b1   : > { %3426 = shalt.err (!%p3423_p3)
}
 0x1b2   : > { %s3427_s20 = scalar_lea.hbm %s4624_s10, 2048  ;;  %s3431_s27 = scalar_lea.hbm %s4677_s4, 4096 }
 0x1b3   : > { %p3428_p4 = scmp.ne.s32.totalorder %s4624_s10, %s3427_s20  ;;  %p3432_p9 = scmp.lt.s32.totalorder %s4624_s10, %s4677_s4 }
 0x1b4   : > { %p3433_p10 = scmp.lt.s32.totalorder %s3431_s27, %s3427_s20 }
 0x1b5   : > { %p3429_p7 = pnand %p3428_p4, %p3541_p5 }
 0x1b6   : > { %p3434_p11 = por %p3433_p10, %p3432_p9 }
 0x1b7   : > { %p3430_p8 = pneg %p3429_p7 }
 0x1b9   : > { %p3435_p12 = pnand %p3434_p11, %p3430_p8 }
 0x1bb   : > { %3438 = shalt.err (!%p3435_p12)
}
 0x1bc   : > { %s3476_s30 = smov 128   ;;  %s3477_s5 = smov 8  }
 0x1bd   : > { %3340 = dma.vmem_to_hbm [thread:$0]  (%p3541_p5), %s4626_s7, 2048, %s4624_s10, %s4633_s19, %s3476_s30, %s3476_s30, %s3477_s5  }
 0x1be PF: > { %p3346_p13 = scmp.ge.s32.totalorder %s3473_s18, 2  ;;  %s2691_s6 = sand.u32 1, %s3461_s15  }
 0x1bf   : > { %s2692_s8 = scalar_lea.sflag [#allocation3], %s2691_s6 }
 0x1c0   : > { %p3343_p0 = pnand %p3346_p13, %p3545_p6 }
 0x1c2   : > { %p3344_p1 = pneg %p3343_p0 }
 0x1c4   : > { %3456 = dma.done.wait (%p3344_p1), %s2692_s8, 2048  }
 0x1c5   : > { %3458 = vsyncadd (%p3344_p1), %s2692_s8, 4294965248  ;;  %p14_p2 = scmp.ge.s32.totalorder %s3528_s21, 4   ;;  %s4759_s15 = smov %s3465_s16 }
 0x1c6   : > { %s4760_s16 = smov %s3469_s17  ;;  %s4761_s17 = smov %s3539_s24 }
 0x1c7   : > { %s4762_s18 = smov %s3528_s21  ;;  %16 = sbr.rel (!%p14_p2) target bundleno = 3 (0x3), region = 71 }
 0x1cc   :  { %2697 = vsyncpa [#allocation3], 1 }
 0x1cd   :  { %2699 = vsyncpa [#allocation3 + $0x1], 1 }

</bundles_post_ra>
